<compile_context>
chip_gen: v7x
topology: tpu7x:2x2x1
jax: 0.10.0
libtpu: 0.0.40
codegen_flags: <defaults>
</compile_context>

<pallas_src>
import functools

import jax
import jax.numpy as jnp
from jax import lax
from jax.experimental import pallas as pl
from jax.experimental.pallas import tpu as pltpu


def _attention_kernel(x_ref, qkv_w_ref, qkv_b_ref, pe_w_ref, pe_b_ref,
                      proj_w_ref, proj_b_ref, o_ref, *,
                      bt, H, W, num_heads, key_dim, head_dim):
    """Fused Attention forward for `bt` images, channel-last (N, C) layout."""
    N = H * W
    C = num_heads * head_dim
    nh_kd = num_heads * key_dim

    # ---- qkv projection for all bt images at once (bf16 MXU, f32 accumulate).
    x = x_ref[...].reshape(bt * N, C)                          # bf16
    qkv = jnp.dot(x, qkv_w_ref[...],
                  preferred_element_type=jnp.float32) + qkv_b_ref[...]

    pe_w = pe_w_ref[...]                                       # (9, C) f32
    pe_b = pe_b_ref[...]                                       # (1, C) f32
    proj_w = proj_w_ref[...]                                   # (C, C) bf16
    proj_b = proj_b_ref[...]                                   # (1, C) f32

    # Column-validity masks for the in-register depthwise 3x3 conv.
    # Hoisted: shared across all images and taps.
    col = lax.broadcasted_iota(jnp.int32, (H, W, C), 1)
    left_ok = col >= 1                 # source column w-1 exists
    right_ok = col <= W - 2            # source column w+1 exists
    zero_row = jnp.zeros((1, W, C), jnp.float32)

    ys = []
    for b in range(bt):
        qkv_i = qkv[b * N:(b + 1) * N]                         # (N, 2*nh_kd+C)

        # Cast once per image (not per head); v stays f32 for the PE conv.
        q_bf = qkv_i[:, :nh_kd].astype(jnp.bfloat16)
        k_bf = qkv_i[:, nh_kd:2 * nh_kd].astype(jnp.bfloat16)
        v_f32 = qkv_i[:, 2 * nh_kd:]                           # (N, C), head-major
        v_bf = v_f32.astype(jnp.bfloat16)

        # ---- per-head attention (scale already folded into q weights/bias).
        heads = []
        for hd in range(num_heads):
            q = q_bf[:, hd * key_dim:(hd + 1) * key_dim]
            k = k_bf[:, hd * key_dim:(hd + 1) * key_dim]
            v = v_bf[:, hd * head_dim:(hd + 1) * head_dim]
            s = lax.dot_general(q, k, (((1,), (1,)), ((), ())),
                                preferred_element_type=jnp.float32)   # (N, N)
            m = jnp.max(s, axis=-1, keepdims=True)
            e = jnp.exp(s - m)
            inv = pl.reciprocal(jnp.sum(e, axis=-1, keepdims=True), approx=True)
            p = (e * inv).astype(jnp.bfloat16)
            heads.append(jnp.dot(p, v, preferred_element_type=jnp.float32))
        attn_out = jnp.concatenate(heads, axis=-1)             # (N, C) f32

        # ---- depthwise 3x3 positional-encoding conv, fully in registers.
        # w-shifts: XLU sublane roll + boundary mask.  h-shifts: leading-dim
        # slice/concat.  No VMEM scratch, no padded-buffer zero fill.
        v3 = v_f32.reshape(H, W, C)
        v_w = (
            jnp.where(left_ok, pltpu.roll(v3, 1, axis=1), 0.0),        # v[., w-1]
            v3,                                                        # v[., w  ]
            jnp.where(right_ok, pltpu.roll(v3, W - 1, axis=1), 0.0),   # v[., w+1]
        )
        pe = jnp.zeros((H, W, C), jnp.float32)
        for dh in range(3):
            for dw in range(3):
                vw = v_w[dw]
                if dh == 0:      # needs v[h-1, .]: shift rows down, zero top
                    tap = jnp.concatenate([zero_row, vw[:H - 1]], axis=0)
                elif dh == 2:    # needs v[h+1, .]: shift rows up, zero bottom
                    tap = jnp.concatenate([vw[1:], zero_row], axis=0)
                else:
                    tap = vw
                pe = pe + tap * pe_w[dh * 3 + dw]
        pe = pe.reshape(N, C) + pe_b

        # ---- residual add (attention output + positional encoding).
        ys.append((attn_out + pe).astype(jnp.bfloat16))

    # ---- output 1x1 projection, batched over the bt images (lane-dense store).
    y = jnp.concatenate(ys, axis=0) if bt > 1 else ys[0]       # (bt*N, C) bf16
    out = jnp.dot(y, proj_w, preferred_element_type=jnp.float32) + proj_b
    o_ref[...] = out.reshape(bt, N, C).astype(o_ref.dtype)


def attention_forward(x, params, *, num_heads, attn_ratio=0.5, block_b=None):
    """Ultralytics Attention.forward.  x: (B, C, H, W) NCHW float32."""
    B, C, H, W = x.shape
    N = H * W
    head_dim = C // num_heads
    key_dim = int(head_dim * attn_ratio)
    nh_kd = key_dim * num_heads
    h = C + 2 * nh_kd
    per_head = 2 * key_dim + head_dim
    scale = key_dim ** -0.5

    # Images folded per grid step.  Default: whole batch (single-TC chips /
    # small B).  On v7x with B >= 4 pass block_b = B // (2*k), k >= 2, so each
    # TensorCore gets several steps and DMA overlaps compute.
    bt = B if block_b is None else block_b
    assert B % bt == 0, "block_b must divide B"

    # qkv conv weight is (h, C, 1, 1) with per-head interleaved [q|k|v] output
    # channels; permute columns to [q(all heads) | k(all heads) | v(all heads)]
    # so the kernel can take wide contiguous slices.
    q_cols, k_cols, v_cols = [], [], []
    for hd in range(num_heads):
        base = hd * per_head
        q_cols += list(range(base, base + key_dim))
        k_cols += list(range(base + key_dim, base + 2 * key_dim))
        v_cols += list(range(base + 2 * key_dim, base + per_head))
    perm = jnp.array(q_cols + k_cols + v_cols, dtype=jnp.int32)

    qkv_w = jnp.transpose(params["qkv_w"].reshape(h, C))[:, perm]     # (C, h)
    qkv_b = params["qkv_b"][perm]
    # Fold the attention scale into the q columns (weight + bias), so the
    # kernel never multiplies the (N, N) scores by scale.
    qkv_w = qkv_w.at[:, :nh_kd].multiply(scale)
    qkv_b = qkv_b.at[:nh_kd].multiply(scale)
    qkv_b = qkv_b.reshape(1, h)

    proj_w = jnp.transpose(params["proj_w"].reshape(C, C))            # (Cin, Cout)
    proj_b = params["proj_b"].reshape(1, C)
    pe_w = jnp.transpose(params["pe_w"].reshape(C, 9))                # (9, C)
    pe_b = params["pe_b"].reshape(1, C)

    # bf16 MXU operands (accumulation stays f32 inside the kernel).
    qkv_w = qkv_w.astype(jnp.bfloat16)
    proj_w = proj_w.astype(jnp.bfloat16)

    # Channel-last bf16 activations; convert only at the module boundary.
    x2d = jnp.transpose(x, (0, 2, 3, 1)).reshape(B, N, C).astype(jnp.bfloat16)

    out = pl.pallas_call(
        functools.partial(_attention_kernel, bt=bt, H=H, W=W,
                          num_heads=num_heads, key_dim=key_dim,
                          head_dim=head_dim),
        out_shape=jax.ShapeDtypeStruct((B, N, C), jnp.float32),
        grid=(B // bt,),
        in_specs=[
            pl.BlockSpec((bt, N, C), lambda i: (i, 0, 0)),   # x (bt images)
            pl.BlockSpec((C, h), lambda i: (0, 0)),          # qkv weight
            pl.BlockSpec((1, h), lambda i: (0, 0)),          # qkv bias
            pl.BlockSpec((9, C), lambda i: (0, 0)),          # pe (dw 3x3) weight
            pl.BlockSpec((1, C), lambda i: (0, 0)),          # pe bias
            pl.BlockSpec((C, C), lambda i: (0, 0)),          # proj weight
            pl.BlockSpec((1, C), lambda i: (0, 0)),          # proj bias
        ],
        out_specs=pl.BlockSpec((bt, N, C), lambda i: (i, 0, 0)),
        compiler_params=pltpu.CompilerParams(
            dimension_semantics=("parallel",),
            vmem_limit_bytes=32 * 1024 * 1024),
    )(x2d, qkv_w, qkv_b, pe_w, pe_b, proj_w, proj_b)

    return jnp.transpose(out.reshape(B, H, W, C), (0, 3, 1, 2))


def init_attention(key, dim, num_heads, attn_ratio=0.5):
    """Deterministic Conv+BN-folded parameters in PyTorch layouts."""
    head_dim = dim // num_heads
    key_dim = int(head_dim * attn_ratio)
    h = dim + 2 * key_dim * num_heads
    ks = jax.random.split(key, 6)
    return {
        "qkv_w": 0.05 * jax.random.normal(ks[0], (h, dim, 1, 1), jnp.float32),
        "qkv_b": 0.01 * jax.random.normal(ks[1], (h,), jnp.float32),
        "proj_w": 0.05 * jax.random.normal(ks[2], (dim, dim, 1, 1), jnp.float32),
        "proj_b": 0.01 * jax.random.normal(ks[3], (dim,), jnp.float32),
        "pe_w": 0.05 * jax.random.normal(ks[4], (dim, 1, 3, 3), jnp.float32),
        "pe_b": 0.01 * jax.random.normal(ks[5], (dim,), jnp.float32),
    }


if __name__ == "__main__":
    key = jax.random.PRNGKey(0)
    kx, kp = jax.random.split(key)

    # Attention(dim=128, num_heads=2, attn_ratio=0.5): head_dim=64, key_dim=32.
    B, DIM, H, W = 2, 128, 8, 8
    NUM_HEADS = 2

    x = jax.random.normal(kx, (B, DIM, H, W), jnp.float32)
    params = init_attention(kp, DIM, NUM_HEADS)

    fwd = jax.jit(functools.partial(attention_forward, num_heads=NUM_HEADS))
    out = jax.block_until_ready(fwd(x, params))

    assert out.shape == (B, DIM, H, W), out.shape
    assert bool(jnp.all(jnp.isfinite(out)))
    print("KERNEL_OK")
</pallas_src>

<mosaic_0001>
module attributes {stable_mosaic.version = 11 : i64} {
  func.func @_attention_kernel(%arg0: i32, %arg1: memref<2x64x128xbf16, #tpu.memory_space<vmem>>, %arg2: memref<128x256xbf16, #tpu.memory_space<vmem>>, %arg3: memref<1x256xf32, #tpu.memory_space<vmem>>, %arg4: memref<9x128xf32, #tpu.memory_space<vmem>>, %arg5: memref<1x128xf32, #tpu.memory_space<vmem>>, %arg6: memref<128x128xbf16, #tpu.memory_space<vmem>>, %arg7: memref<1x128xf32, #tpu.memory_space<vmem>>, %arg8: memref<2x64x128xf32, #tpu.memory_space<vmem>>) attributes {dimension_semantics = [#tpu.dimension_semantics<parallel>], iteration_bounds = array<i64: 1>, scalar_prefetch = 0 : i64, scratch_operands = 0 : i64, tpu.core_type = #tpu.core_type<tc>, window_params = [{transform_indices = @transform_0, window_bounds = array<i64: 2, 64, 128>}, {pipeline_mode = #tpu.pipeline_mode<synchronous>, transform_indices = @transform_1, window_bounds = array<i64: 128, 256>}, {pipeline_mode = #tpu.pipeline_mode<synchronous>, transform_indices = @transform_2, window_bounds = array<i64: 1, 256>}, {pipeline_mode = #tpu.pipeline_mode<synchronous>, transform_indices = @transform_3, window_bounds = array<i64: 9, 128>}, {pipeline_mode = #tpu.pipeline_mode<synchronous>, transform_indices = @transform_4, window_bounds = array<i64: 1, 128>}, {pipeline_mode = #tpu.pipeline_mode<synchronous>, transform_indices = @transform_5, window_bounds = array<i64: 128, 128>}, {pipeline_mode = #tpu.pipeline_mode<synchronous>, transform_indices = @transform_6, window_bounds = array<i64: 1, 128>}, {transform_indices = @transform_7, window_bounds = array<i64: 2, 64, 128>}]} {
    %c0 = arith.constant 0 : index
    %c0_0 = arith.constant 0 : index
    %c0_1 = arith.constant 0 : index
    %0 = vector.load %arg1[%c0, %c0_0, %c0_1] : memref<2x64x128xbf16, #tpu.memory_space<vmem>>, vector<2x64x128xbf16>
    %1 = vector.shape_cast %0 : vector<2x64x128xbf16> to vector<128x128xbf16>
    %c0_2 = arith.constant 0 : index
    %c0_3 = arith.constant 0 : index
    %2 = vector.load %arg2[%c0_2, %c0_3] : memref<128x256xbf16, #tpu.memory_space<vmem>>, vector<128x256xbf16>
    %cst = arith.constant dense<0.000000e+00> : vector<128x256xf32>
    %3 = tpu.matmul %1, %2, %cst {dimension_numbers = #tpu.dot_dimension_numbers<[1], [0], [0], [1], [0, 0, 1, 1], [], []>} : vector<128x128xbf16>, vector<128x256xbf16>, vector<128x256xf32> -> vector<128x256xf32>
    %c0_4 = arith.constant 0 : index
    %c0_5 = arith.constant 0 : index
    %4 = vector.load %arg3[%c0_4, %c0_5] : memref<1x256xf32, #tpu.memory_space<vmem>>, vector<1x256xf32>
    %5 = vector.broadcast %4 : vector<1x256xf32> to vector<128x256xf32>
    %6 = arith.addf %3, %5 : vector<128x256xf32>
    %c0_6 = arith.constant 0 : index
    %c0_7 = arith.constant 0 : index
    %7 = vector.load %arg4[%c0_6, %c0_7] : memref<9x128xf32, #tpu.memory_space<vmem>>, vector<9x128xf32>
    %c0_8 = arith.constant 0 : index
    %c0_9 = arith.constant 0 : index
    %8 = vector.load %arg5[%c0_8, %c0_9] : memref<1x128xf32, #tpu.memory_space<vmem>>, vector<1x128xf32>
    %c0_10 = arith.constant 0 : index
    %c0_11 = arith.constant 0 : index
    %9 = vector.load %arg6[%c0_10, %c0_11] : memref<128x128xbf16, #tpu.memory_space<vmem>>, vector<128x128xbf16>
    %c0_12 = arith.constant 0 : index
    %c0_13 = arith.constant 0 : index
    %10 = vector.load %arg7[%c0_12, %c0_13] : memref<1x128xf32, #tpu.memory_space<vmem>>, vector<1x128xf32>
    %11 = tpu.iota {dimensions = array<i32: 1>} : vector<8x8x128xi32>
    %c1_i32 = arith.constant 1 : i32
    %12 = vector.broadcast %c1_i32 : i32 to vector<8x8x128xi32>
    %13 = arith.cmpi sge, %11, %12 : vector<8x8x128xi32>
    %c6_i32 = arith.constant 6 : i32
    %14 = vector.broadcast %c6_i32 : i32 to vector<8x8x128xi32>
    %15 = arith.cmpi sle, %11, %14 : vector<8x8x128xi32>
    %cst_14 = arith.constant 0.000000e+00 : f32
    %16 = vector.broadcast %cst_14 : f32 to vector<1x8x128xf32>
    %17 = vector.extract_strided_slice %6 {offsets = [0, 0], sizes = [64, 256], strides = [1, 1]} : vector<128x256xf32> to vector<64x256xf32>
    %18 = vector.extract_strided_slice %17 {offsets = [0, 0], sizes = [64, 64], strides = [1, 1]} : vector<64x256xf32> to vector<64x64xf32>
    %19 = arith.truncf %18 : vector<64x64xf32> to vector<64x64xbf16>
    %20 = vector.extract_strided_slice %17 {offsets = [0, 64], sizes = [64, 64], strides = [1, 1]} : vector<64x256xf32> to vector<64x64xf32>
    %21 = arith.truncf %20 : vector<64x64xf32> to vector<64x64xbf16>
    %22 = vector.extract_strided_slice %17 {offsets = [0, 128], sizes = [64, 128], strides = [1, 1]} : vector<64x256xf32> to vector<64x128xf32>
    %23 = arith.truncf %22 : vector<64x128xf32> to vector<64x128xbf16>
    %24 = vector.extract_strided_slice %19 {offsets = [0, 0], sizes = [64, 32], strides = [1, 1]} : vector<64x64xbf16> to vector<64x32xbf16>
    %25 = vector.extract_strided_slice %21 {offsets = [0, 0], sizes = [64, 32], strides = [1, 1]} : vector<64x64xbf16> to vector<64x32xbf16>
    %26 = vector.extract_strided_slice %23 {offsets = [0, 0], sizes = [64, 64], strides = [1, 1]} : vector<64x128xbf16> to vector<64x64xbf16>
    %cst_15 = arith.constant dense<0.000000e+00> : vector<64x64xf32>
    %27 = tpu.matmul %24, %25, %cst_15 {dimension_numbers = #tpu.dot_dimension_numbers<[1], [1], [0], [0], [0, 0, 1, 0], [], []>} : vector<64x32xbf16>, vector<64x32xbf16>, vector<64x64xf32> -> vector<64x64xf32>
    %cst_16 = arith.constant dense<0xFF800000> : vector<64xf32>
    %28 = vector.multi_reduction <maximumf>, %27, %cst_16 [1] : vector<64x64xf32> to vector<64xf32>
    %29 = vector.shape_cast %28 : vector<64xf32> to vector<64x1xf32>
    %30 = vector.broadcast %29 : vector<64x1xf32> to vector<64x64xf32>
    %31 = arith.subf %27, %30 : vector<64x64xf32>
    %32 = math.exp %31 : vector<64x64xf32>
    %cst_17 = arith.constant dense<0.000000e+00> : vector<64xf32>
    %33 = vector.multi_reduction <add>, %32, %cst_17 [1] : vector<64x64xf32> to vector<64xf32>
    %34 = vector.shape_cast %33 : vector<64xf32> to vector<64x1xf32>
    %35 = tpu.reciprocal %34 {approx = true} : vector<64x1xf32> -> vector<64x1xf32>
    %36 = vector.broadcast %35 : vector<64x1xf32> to vector<64x64xf32>
    %37 = arith.mulf %32, %36 : vector<64x64xf32>
    %38 = arith.truncf %37 : vector<64x64xf32> to vector<64x64xbf16>
    %cst_18 = arith.constant dense<0.000000e+00> : vector<64x64xf32>
    %39 = tpu.matmul %38, %26, %cst_18 {dimension_numbers = #tpu.dot_dimension_numbers<[1], [0], [0], [1], [0, 0, 1, 1], [], []>} : vector<64x64xbf16>, vector<64x64xbf16>, vector<64x64xf32> -> vector<64x64xf32>
    %40 = vector.extract_strided_slice %19 {offsets = [0, 32], sizes = [64, 32], strides = [1, 1]} : vector<64x64xbf16> to vector<64x32xbf16>
    %41 = vector.extract_strided_slice %21 {offsets = [0, 32], sizes = [64, 32], strides = [1, 1]} : vector<64x64xbf16> to vector<64x32xbf16>
    %42 = vector.extract_strided_slice %23 {offsets = [0, 64], sizes = [64, 64], strides = [1, 1]} : vector<64x128xbf16> to vector<64x64xbf16>
    %cst_19 = arith.constant dense<0.000000e+00> : vector<64x64xf32>
    %43 = tpu.matmul %40, %41, %cst_19 {dimension_numbers = #tpu.dot_dimension_numbers<[1], [1], [0], [0], [0, 0, 1, 0], [], []>} : vector<64x32xbf16>, vector<64x32xbf16>, vector<64x64xf32> -> vector<64x64xf32>
    %cst_20 = arith.constant dense<0xFF800000> : vector<64xf32>
    %44 = vector.multi_reduction <maximumf>, %43, %cst_20 [1] : vector<64x64xf32> to vector<64xf32>
    %45 = vector.shape_cast %44 : vector<64xf32> to vector<64x1xf32>
    %46 = vector.broadcast %45 : vector<64x1xf32> to vector<64x64xf32>
    %47 = arith.subf %43, %46 : vector<64x64xf32>
    %48 = math.exp %47 : vector<64x64xf32>
    %cst_21 = arith.constant dense<0.000000e+00> : vector<64xf32>
    %49 = vector.multi_reduction <add>, %48, %cst_21 [1] : vector<64x64xf32> to vector<64xf32>
    %50 = vector.shape_cast %49 : vector<64xf32> to vector<64x1xf32>
    %51 = tpu.reciprocal %50 {approx = true} : vector<64x1xf32> -> vector<64x1xf32>
    %52 = vector.broadcast %51 : vector<64x1xf32> to vector<64x64xf32>
    %53 = arith.mulf %48, %52 : vector<64x64xf32>
    %54 = arith.truncf %53 : vector<64x64xf32> to vector<64x64xbf16>
    %cst_22 = arith.constant dense<0.000000e+00> : vector<64x64xf32>
    %55 = tpu.matmul %54, %42, %cst_22 {dimension_numbers = #tpu.dot_dimension_numbers<[1], [0], [0], [1], [0, 0, 1, 1], [], []>} : vector<64x64xbf16>, vector<64x64xbf16>, vector<64x64xf32> -> vector<64x64xf32>
    %56 = tpu.concatenate %39, %55 in 1 : vector<64x64xf32>, vector<64x64xf32> -> vector<64x128xf32>
    %57 = vector.shape_cast %22 : vector<64x128xf32> to vector<8x8x128xf32>
    %c1_i32_23 = arith.constant 1 : i32
    %58 = tpu.dynamic_rotate %57 by %c1_i32_23 dim 1 : vector<8x8x128xf32>, i32 -> vector<8x8x128xf32>
    %cst_24 = arith.constant 0.000000e+00 : f32
    %59 = vector.broadcast %cst_24 : f32 to vector<8x8x128xf32>
    %60 = arith.select %13, %58, %59 : vector<8x8x128xi1>, vector<8x8x128xf32>
    %c7_i32 = arith.constant 7 : i32
    %61 = tpu.dynamic_rotate %57 by %c7_i32 dim 1 : vector<8x8x128xf32>, i32 -> vector<8x8x128xf32>
    %cst_25 = arith.constant 0.000000e+00 : f32
    %62 = vector.broadcast %cst_25 : f32 to vector<8x8x128xf32>
    %63 = arith.select %15, %61, %62 : vector<8x8x128xi1>, vector<8x8x128xf32>
    %cst_26 = arith.constant 0.000000e+00 : f32
    %64 = vector.broadcast %cst_26 : f32 to vector<8x8x128xf32>
    %65 = vector.extract_strided_slice %60 {offsets = [0, 0, 0], sizes = [7, 8, 128], strides = [1, 1, 1]} : vector<8x8x128xf32> to vector<7x8x128xf32>
    %66 = tpu.concatenate %16, %65 in 0 : vector<1x8x128xf32>, vector<7x8x128xf32> -> vector<8x8x128xf32>
    %67 = vector.extract_strided_slice %7 {offsets = [0, 0], sizes = [1, 128], strides = [1, 1]} : vector<9x128xf32> to vector<1x128xf32>
    %68 = vector.shape_cast %67 : vector<1x128xf32> to vector<128xf32>
    %69 = vector.shape_cast %68 : vector<128xf32> to vector<1x1x128xf32>
    %70 = vector.broadcast %69 : vector<1x1x128xf32> to vector<8x8x128xf32>
    %71 = arith.mulf %66, %70 : vector<8x8x128xf32>
    %72 = arith.addf %64, %71 : vector<8x8x128xf32>
    %73 = vector.extract_strided_slice %57 {offsets = [0, 0, 0], sizes = [7, 8, 128], strides = [1, 1, 1]} : vector<8x8x128xf32> to vector<7x8x128xf32>
    %74 = tpu.concatenate %16, %73 in 0 : vector<1x8x128xf32>, vector<7x8x128xf32> -> vector<8x8x128xf32>
    %75 = vector.extract_strided_slice %7 {offsets = [1, 0], sizes = [1, 128], strides = [1, 1]} : vector<9x128xf32> to vector<1x128xf32>
    %76 = vector.shape_cast %75 : vector<1x128xf32> to vector<128xf32>
    %77 = vector.shape_cast %76 : vector<128xf32> to vector<1x1x128xf32>
    %78 = vector.broadcast %77 : vector<1x1x128xf32> to vector<8x8x128xf32>
    %79 = arith.mulf %74, %78 : vector<8x8x128xf32>
    %80 = arith.addf %72, %79 : vector<8x8x128xf32>
    %81 = vector.extract_strided_slice %63 {offsets = [0, 0, 0], sizes = [7, 8, 128], strides = [1, 1, 1]} : vector<8x8x128xf32> to vector<7x8x128xf32>
    %82 = tpu.concatenate %16, %81 in 0 : vector<1x8x128xf32>, vector<7x8x128xf32> -> vector<8x8x128xf32>
    %83 = vector.extract_strided_slice %7 {offsets = [2, 0], sizes = [1, 128], strides = [1, 1]} : vector<9x128xf32> to vector<1x128xf32>
    %84 = vector.shape_cast %83 : vector<1x128xf32> to vector<128xf32>
    %85 = vector.shape_cast %84 : vector<128xf32> to vector<1x1x128xf32>
    %86 = vector.broadcast %85 : vector<1x1x128xf32> to vector<8x8x128xf32>
    %87 = arith.mulf %82, %86 : vector<8x8x128xf32>
    %88 = arith.addf %80, %87 : vector<8x8x128xf32>
    %89 = vector.extract_strided_slice %7 {offsets = [3, 0], sizes = [1, 128], strides = [1, 1]} : vector<9x128xf32> to vector<1x128xf32>
    %90 = vector.shape_cast %89 : vector<1x128xf32> to vector<128xf32>
    %91 = vector.shape_cast %90 : vector<128xf32> to vector<1x1x128xf32>
    %92 = vector.broadcast %91 : vector<1x1x128xf32> to vector<8x8x128xf32>
    %93 = arith.mulf %60, %92 : vector<8x8x128xf32>
    %94 = arith.addf %88, %93 : vector<8x8x128xf32>
    %95 = vector.extract_strided_slice %7 {offsets = [4, 0], sizes = [1, 128], strides = [1, 1]} : vector<9x128xf32> to vector<1x128xf32>
    %96 = vector.shape_cast %95 : vector<1x128xf32> to vector<128xf32>
    %97 = vector.shape_cast %96 : vector<128xf32> to vector<1x1x128xf32>
    %98 = vector.broadcast %97 : vector<1x1x128xf32> to vector<8x8x128xf32>
    %99 = arith.mulf %57, %98 : vector<8x8x128xf32>
    %100 = arith.addf %94, %99 : vector<8x8x128xf32>
    %101 = vector.extract_strided_slice %7 {offsets = [5, 0], sizes = [1, 128], strides = [1, 1]} : vector<9x128xf32> to vector<1x128xf32>
    %102 = vector.shape_cast %101 : vector<1x128xf32> to vector<128xf32>
    %103 = vector.shape_cast %102 : vector<128xf32> to vector<1x1x128xf32>
    %104 = vector.broadcast %103 : vector<1x1x128xf32> to vector<8x8x128xf32>
    %105 = arith.mulf %63, %104 : vector<8x8x128xf32>
    %106 = arith.addf %100, %105 : vector<8x8x128xf32>
    %107 = vector.extract_strided_slice %60 {offsets = [1, 0, 0], sizes = [7, 8, 128], strides = [1, 1, 1]} : vector<8x8x128xf32> to vector<7x8x128xf32>
    %108 = tpu.concatenate %107, %16 in 0 : vector<7x8x128xf32>, vector<1x8x128xf32> -> vector<8x8x128xf32>
    %109 = vector.extract_strided_slice %7 {offsets = [6, 0], sizes = [1, 128], strides = [1, 1]} : vector<9x128xf32> to vector<1x128xf32>
    %110 = vector.shape_cast %109 : vector<1x128xf32> to vector<128xf32>
    %111 = vector.shape_cast %110 : vector<128xf32> to vector<1x1x128xf32>
    %112 = vector.broadcast %111 : vector<1x1x128xf32> to vector<8x8x128xf32>
    %113 = arith.mulf %108, %112 : vector<8x8x128xf32>
    %114 = arith.addf %106, %113 : vector<8x8x128xf32>
    %115 = vector.extract_strided_slice %57 {offsets = [1, 0, 0], sizes = [7, 8, 128], strides = [1, 1, 1]} : vector<8x8x128xf32> to vector<7x8x128xf32>
    %116 = tpu.concatenate %115, %16 in 0 : vector<7x8x128xf32>, vector<1x8x128xf32> -> vector<8x8x128xf32>
    %117 = vector.extract_strided_slice %7 {offsets = [7, 0], sizes = [1, 128], strides = [1, 1]} : vector<9x128xf32> to vector<1x128xf32>
    %118 = vector.shape_cast %117 : vector<1x128xf32> to vector<128xf32>
    %119 = vector.shape_cast %118 : vector<128xf32> to vector<1x1x128xf32>
    %120 = vector.broadcast %119 : vector<1x1x128xf32> to vector<8x8x128xf32>
    %121 = arith.mulf %116, %120 : vector<8x8x128xf32>
    %122 = arith.addf %114, %121 : vector<8x8x128xf32>
    %123 = vector.extract_strided_slice %63 {offsets = [1, 0, 0], sizes = [7, 8, 128], strides = [1, 1, 1]} : vector<8x8x128xf32> to vector<7x8x128xf32>
    %124 = tpu.concatenate %123, %16 in 0 : vector<7x8x128xf32>, vector<1x8x128xf32> -> vector<8x8x128xf32>
    %125 = vector.extract_strided_slice %7 {offsets = [8, 0], sizes = [1, 128], strides = [1, 1]} : vector<9x128xf32> to vector<1x128xf32>
    %126 = vector.shape_cast %125 : vector<1x128xf32> to vector<128xf32>
    %127 = vector.shape_cast %126 : vector<128xf32> to vector<1x1x128xf32>
    %128 = vector.broadcast %127 : vector<1x1x128xf32> to vector<8x8x128xf32>
    %129 = arith.mulf %124, %128 : vector<8x8x128xf32>
    %130 = arith.addf %122, %129 : vector<8x8x128xf32>
    %131 = vector.shape_cast %130 : vector<8x8x128xf32> to vector<64x128xf32>
    %132 = vector.broadcast %8 : vector<1x128xf32> to vector<64x128xf32>
    %133 = arith.addf %131, %132 : vector<64x128xf32>
    %134 = arith.addf %56, %133 : vector<64x128xf32>
    %135 = arith.truncf %134 : vector<64x128xf32> to vector<64x128xbf16>
    %136 = vector.extract_strided_slice %6 {offsets = [64, 0], sizes = [64, 256], strides = [1, 1]} : vector<128x256xf32> to vector<64x256xf32>
    %137 = vector.extract_strided_slice %136 {offsets = [0, 0], sizes = [64, 64], strides = [1, 1]} : vector<64x256xf32> to vector<64x64xf32>
    %138 = arith.truncf %137 : vector<64x64xf32> to vector<64x64xbf16>
    %139 = vector.extract_strided_slice %136 {offsets = [0, 64], sizes = [64, 64], strides = [1, 1]} : vector<64x256xf32> to vector<64x64xf32>
    %140 = arith.truncf %139 : vector<64x64xf32> to vector<64x64xbf16>
    %141 = vector.extract_strided_slice %136 {offsets = [0, 128], sizes = [64, 128], strides = [1, 1]} : vector<64x256xf32> to vector<64x128xf32>
    %142 = arith.truncf %141 : vector<64x128xf32> to vector<64x128xbf16>
    %143 = vector.extract_strided_slice %138 {offsets = [0, 0], sizes = [64, 32], strides = [1, 1]} : vector<64x64xbf16> to vector<64x32xbf16>
    %144 = vector.extract_strided_slice %140 {offsets = [0, 0], sizes = [64, 32], strides = [1, 1]} : vector<64x64xbf16> to vector<64x32xbf16>
    %145 = vector.extract_strided_slice %142 {offsets = [0, 0], sizes = [64, 64], strides = [1, 1]} : vector<64x128xbf16> to vector<64x64xbf16>
    %cst_27 = arith.constant dense<0.000000e+00> : vector<64x64xf32>
    %146 = tpu.matmul %143, %144, %cst_27 {dimension_numbers = #tpu.dot_dimension_numbers<[1], [1], [0], [0], [0, 0, 1, 0], [], []>} : vector<64x32xbf16>, vector<64x32xbf16>, vector<64x64xf32> -> vector<64x64xf32>
    %cst_28 = arith.constant dense<0xFF800000> : vector<64xf32>
    %147 = vector.multi_reduction <maximumf>, %146, %cst_28 [1] : vector<64x64xf32> to vector<64xf32>
    %148 = vector.shape_cast %147 : vector<64xf32> to vector<64x1xf32>
    %149 = vector.broadcast %148 : vector<64x1xf32> to vector<64x64xf32>
    %150 = arith.subf %146, %149 : vector<64x64xf32>
    %151 = math.exp %150 : vector<64x64xf32>
    %cst_29 = arith.constant dense<0.000000e+00> : vector<64xf32>
    %152 = vector.multi_reduction <add>, %151, %cst_29 [1] : vector<64x64xf32> to vector<64xf32>
    %153 = vector.shape_cast %152 : vector<64xf32> to vector<64x1xf32>
    %154 = tpu.reciprocal %153 {approx = true} : vector<64x1xf32> -> vector<64x1xf32>
    %155 = vector.broadcast %154 : vector<64x1xf32> to vector<64x64xf32>
    %156 = arith.mulf %151, %155 : vector<64x64xf32>
    %157 = arith.truncf %156 : vector<64x64xf32> to vector<64x64xbf16>
    %cst_30 = arith.constant dense<0.000000e+00> : vector<64x64xf32>
    %158 = tpu.matmul %157, %145, %cst_30 {dimension_numbers = #tpu.dot_dimension_numbers<[1], [0], [0], [1], [0, 0, 1, 1], [], []>} : vector<64x64xbf16>, vector<64x64xbf16>, vector<64x64xf32> -> vector<64x64xf32>
    %159 = vector.extract_strided_slice %138 {offsets = [0, 32], sizes = [64, 32], strides = [1, 1]} : vector<64x64xbf16> to vector<64x32xbf16>
    %160 = vector.extract_strided_slice %140 {offsets = [0, 32], sizes = [64, 32], strides = [1, 1]} : vector<64x64xbf16> to vector<64x32xbf16>
    %161 = vector.extract_strided_slice %142 {offsets = [0, 64], sizes = [64, 64], strides = [1, 1]} : vector<64x128xbf16> to vector<64x64xbf16>
    %cst_31 = arith.constant dense<0.000000e+00> : vector<64x64xf32>
    %162 = tpu.matmul %159, %160, %cst_31 {dimension_numbers = #tpu.dot_dimension_numbers<[1], [1], [0], [0], [0, 0, 1, 0], [], []>} : vector<64x32xbf16>, vector<64x32xbf16>, vector<64x64xf32> -> vector<64x64xf32>
    %cst_32 = arith.constant dense<0xFF800000> : vector<64xf32>
    %163 = vector.multi_reduction <maximumf>, %162, %cst_32 [1] : vector<64x64xf32> to vector<64xf32>
    %164 = vector.shape_cast %163 : vector<64xf32> to vector<64x1xf32>
    %165 = vector.broadcast %164 : vector<64x1xf32> to vector<64x64xf32>
    %166 = arith.subf %162, %165 : vector<64x64xf32>
    %167 = math.exp %166 : vector<64x64xf32>
    %cst_33 = arith.constant dense<0.000000e+00> : vector<64xf32>
    %168 = vector.multi_reduction <add>, %167, %cst_33 [1] : vector<64x64xf32> to vector<64xf32>
    %169 = vector.shape_cast %168 : vector<64xf32> to vector<64x1xf32>
    %170 = tpu.reciprocal %169 {approx = true} : vector<64x1xf32> -> vector<64x1xf32>
    %171 = vector.broadcast %170 : vector<64x1xf32> to vector<64x64xf32>
    %172 = arith.mulf %167, %171 : vector<64x64xf32>
    %173 = arith.truncf %172 : vector<64x64xf32> to vector<64x64xbf16>
    %cst_34 = arith.constant dense<0.000000e+00> : vector<64x64xf32>
    %174 = tpu.matmul %173, %161, %cst_34 {dimension_numbers = #tpu.dot_dimension_numbers<[1], [0], [0], [1], [0, 0, 1, 1], [], []>} : vector<64x64xbf16>, vector<64x64xbf16>, vector<64x64xf32> -> vector<64x64xf32>
    %175 = tpu.concatenate %158, %174 in 1 : vector<64x64xf32>, vector<64x64xf32> -> vector<64x128xf32>
    %176 = vector.shape_cast %141 : vector<64x128xf32> to vector<8x8x128xf32>
    %c1_i32_35 = arith.constant 1 : i32
    %177 = tpu.dynamic_rotate %176 by %c1_i32_35 dim 1 : vector<8x8x128xf32>, i32 -> vector<8x8x128xf32>
    %cst_36 = arith.constant 0.000000e+00 : f32
    %178 = vector.broadcast %cst_36 : f32 to vector<8x8x128xf32>
    %179 = arith.select %13, %177, %178 : vector<8x8x128xi1>, vector<8x8x128xf32>
    %c7_i32_37 = arith.constant 7 : i32
    %180 = tpu.dynamic_rotate %176 by %c7_i32_37 dim 1 : vector<8x8x128xf32>, i32 -> vector<8x8x128xf32>
    %cst_38 = arith.constant 0.000000e+00 : f32
    %181 = vector.broadcast %cst_38 : f32 to vector<8x8x128xf32>
    %182 = arith.select %15, %180, %181 : vector<8x8x128xi1>, vector<8x8x128xf32>
    %cst_39 = arith.constant 0.000000e+00 : f32
    %183 = vector.broadcast %cst_39 : f32 to vector<8x8x128xf32>
    %184 = vector.extract_strided_slice %179 {offsets = [0, 0, 0], sizes = [7, 8, 128], strides = [1, 1, 1]} : vector<8x8x128xf32> to vector<7x8x128xf32>
    %185 = tpu.concatenate %16, %184 in 0 : vector<1x8x128xf32>, vector<7x8x128xf32> -> vector<8x8x128xf32>
    %186 = vector.extract_strided_slice %7 {offsets = [0, 0], sizes = [1, 128], strides = [1, 1]} : vector<9x128xf32> to vector<1x128xf32>
    %187 = vector.shape_cast %186 : vector<1x128xf32> to vector<128xf32>
    %188 = vector.shape_cast %187 : vector<128xf32> to vector<1x1x128xf32>
    %189 = vector.broadcast %188 : vector<1x1x128xf32> to vector<8x8x128xf32>
    %190 = arith.mulf %185, %189 : vector<8x8x128xf32>
    %191 = arith.addf %183, %190 : vector<8x8x128xf32>
    %192 = vector.extract_strided_slice %176 {offsets = [0, 0, 0], sizes = [7, 8, 128], strides = [1, 1, 1]} : vector<8x8x128xf32> to vector<7x8x128xf32>
    %193 = tpu.concatenate %16, %192 in 0 : vector<1x8x128xf32>, vector<7x8x128xf32> -> vector<8x8x128xf32>
    %194 = vector.extract_strided_slice %7 {offsets = [1, 0], sizes = [1, 128], strides = [1, 1]} : vector<9x128xf32> to vector<1x128xf32>
    %195 = vector.shape_cast %194 : vector<1x128xf32> to vector<128xf32>
    %196 = vector.shape_cast %195 : vector<128xf32> to vector<1x1x128xf32>
    %197 = vector.broadcast %196 : vector<1x1x128xf32> to vector<8x8x128xf32>
    %198 = arith.mulf %193, %197 : vector<8x8x128xf32>
    %199 = arith.addf %191, %198 : vector<8x8x128xf32>
    %200 = vector.extract_strided_slice %182 {offsets = [0, 0, 0], sizes = [7, 8, 128], strides = [1, 1, 1]} : vector<8x8x128xf32> to vector<7x8x128xf32>
    %201 = tpu.concatenate %16, %200 in 0 : vector<1x8x128xf32>, vector<7x8x128xf32> -> vector<8x8x128xf32>
    %202 = vector.extract_strided_slice %7 {offsets = [2, 0], sizes = [1, 128], strides = [1, 1]} : vector<9x128xf32> to vector<1x128xf32>
    %203 = vector.shape_cast %202 : vector<1x128xf32> to vector<128xf32>
    %204 = vector.shape_cast %203 : vector<128xf32> to vector<1x1x128xf32>
    %205 = vector.broadcast %204 : vector<1x1x128xf32> to vector<8x8x128xf32>
    %206 = arith.mulf %201, %205 : vector<8x8x128xf32>
    %207 = arith.addf %199, %206 : vector<8x8x128xf32>
    %208 = vector.extract_strided_slice %7 {offsets = [3, 0], sizes = [1, 128], strides = [1, 1]} : vector<9x128xf32> to vector<1x128xf32>
    %209 = vector.shape_cast %208 : vector<1x128xf32> to vector<128xf32>
    %210 = vector.shape_cast %209 : vector<128xf32> to vector<1x1x128xf32>
    %211 = vector.broadcast %210 : vector<1x1x128xf32> to vector<8x8x128xf32>
    %212 = arith.mulf %179, %211 : vector<8x8x128xf32>
    %213 = arith.addf %207, %212 : vector<8x8x128xf32>
    %214 = vector.extract_strided_slice %7 {offsets = [4, 0], sizes = [1, 128], strides = [1, 1]} : vector<9x128xf32> to vector<1x128xf32>
    %215 = vector.shape_cast %214 : vector<1x128xf32> to vector<128xf32>
    %216 = vector.shape_cast %215 : vector<128xf32> to vector<1x1x128xf32>
    %217 = vector.broadcast %216 : vector<1x1x128xf32> to vector<8x8x128xf32>
    %218 = arith.mulf %176, %217 : vector<8x8x128xf32>
    %219 = arith.addf %213, %218 : vector<8x8x128xf32>
    %220 = vector.extract_strided_slice %7 {offsets = [5, 0], sizes = [1, 128], strides = [1, 1]} : vector<9x128xf32> to vector<1x128xf32>
    %221 = vector.shape_cast %220 : vector<1x128xf32> to vector<128xf32>
    %222 = vector.shape_cast %221 : vector<128xf32> to vector<1x1x128xf32>
    %223 = vector.broadcast %222 : vector<1x1x128xf32> to vector<8x8x128xf32>
    %224 = arith.mulf %182, %223 : vector<8x8x128xf32>
    %225 = arith.addf %219, %224 : vector<8x8x128xf32>
    %226 = vector.extract_strided_slice %179 {offsets = [1, 0, 0], sizes = [7, 8, 128], strides = [1, 1, 1]} : vector<8x8x128xf32> to vector<7x8x128xf32>
    %227 = tpu.concatenate %226, %16 in 0 : vector<7x8x128xf32>, vector<1x8x128xf32> -> vector<8x8x128xf32>
    %228 = vector.extract_strided_slice %7 {offsets = [6, 0], sizes = [1, 128], strides = [1, 1]} : vector<9x128xf32> to vector<1x128xf32>
    %229 = vector.shape_cast %228 : vector<1x128xf32> to vector<128xf32>
    %230 = vector.shape_cast %229 : vector<128xf32> to vector<1x1x128xf32>
    %231 = vector.broadcast %230 : vector<1x1x128xf32> to vector<8x8x128xf32>
    %232 = arith.mulf %227, %231 : vector<8x8x128xf32>
    %233 = arith.addf %225, %232 : vector<8x8x128xf32>
    %234 = vector.extract_strided_slice %176 {offsets = [1, 0, 0], sizes = [7, 8, 128], strides = [1, 1, 1]} : vector<8x8x128xf32> to vector<7x8x128xf32>
    %235 = tpu.concatenate %234, %16 in 0 : vector<7x8x128xf32>, vector<1x8x128xf32> -> vector<8x8x128xf32>
    %236 = vector.extract_strided_slice %7 {offsets = [7, 0], sizes = [1, 128], strides = [1, 1]} : vector<9x128xf32> to vector<1x128xf32>
    %237 = vector.shape_cast %236 : vector<1x128xf32> to vector<128xf32>
    %238 = vector.shape_cast %237 : vector<128xf32> to vector<1x1x128xf32>
    %239 = vector.broadcast %238 : vector<1x1x128xf32> to vector<8x8x128xf32>
    %240 = arith.mulf %235, %239 : vector<8x8x128xf32>
    %241 = arith.addf %233, %240 : vector<8x8x128xf32>
    %242 = vector.extract_strided_slice %182 {offsets = [1, 0, 0], sizes = [7, 8, 128], strides = [1, 1, 1]} : vector<8x8x128xf32> to vector<7x8x128xf32>
    %243 = tpu.concatenate %242, %16 in 0 : vector<7x8x128xf32>, vector<1x8x128xf32> -> vector<8x8x128xf32>
    %244 = vector.extract_strided_slice %7 {offsets = [8, 0], sizes = [1, 128], strides = [1, 1]} : vector<9x128xf32> to vector<1x128xf32>
    %245 = vector.shape_cast %244 : vector<1x128xf32> to vector<128xf32>
    %246 = vector.shape_cast %245 : vector<128xf32> to vector<1x1x128xf32>
    %247 = vector.broadcast %246 : vector<1x1x128xf32> to vector<8x8x128xf32>
    %248 = arith.mulf %243, %247 : vector<8x8x128xf32>
    %249 = arith.addf %241, %248 : vector<8x8x128xf32>
    %250 = vector.shape_cast %249 : vector<8x8x128xf32> to vector<64x128xf32>
    %251 = vector.broadcast %8 : vector<1x128xf32> to vector<64x128xf32>
    %252 = arith.addf %250, %251 : vector<64x128xf32>
    %253 = arith.addf %175, %252 : vector<64x128xf32>
    %254 = arith.truncf %253 : vector<64x128xf32> to vector<64x128xbf16>
    %255 = tpu.concatenate %135, %254 in 0 : vector<64x128xbf16>, vector<64x128xbf16> -> vector<128x128xbf16>
    %cst_40 = arith.constant dense<0.000000e+00> : vector<128x128xf32>
    %256 = tpu.matmul %255, %9, %cst_40 {dimension_numbers = #tpu.dot_dimension_numbers<[1], [0], [0], [1], [0, 0, 1, 1], [], []>} : vector<128x128xbf16>, vector<128x128xbf16>, vector<128x128xf32> -> vector<128x128xf32>
    %257 = vector.broadcast %10 : vector<1x128xf32> to vector<128x128xf32>
    %258 = arith.addf %256, %257 : vector<128x128xf32>
    %259 = vector.shape_cast %258 : vector<128x128xf32> to vector<2x64x128xf32>
    %c0_41 = arith.constant 0 : index
    %c0_42 = arith.constant 0 : index
    %c0_43 = arith.constant 0 : index
    %260 = vector.load %arg8[%c0_41, %c0_42, %c0_43] : memref<2x64x128xf32, #tpu.memory_space<vmem>>, vector<2x64x128xf32>
    tpu.vector_store %arg8[%c0_41, %c0_42, %c0_43], %259 {strides = array<i32>} : memref<2x64x128xf32, #tpu.memory_space<vmem>>, vector<2x64x128xf32>,
    return
  }
  func.func @transform_0(%arg0: i32) -> (i32, i32, i32) {
    %c0_i32 = arith.constant 0 : i32
    %c0_i32_0 = arith.constant 0 : i32
    %c0_i32_1 = arith.constant 0 : i32
    return %arg0, %c0_i32, %c0_i32_0 : i32, i32, i32
  }
  func.func @transform_1(%arg0: i32) -> (i32, i32) {
    %c0_i32 = arith.constant 0 : i32
    %c0_i32_0 = arith.constant 0 : i32
    %c0_i32_1 = arith.constant 0 : i32
    return %c0_i32, %c0_i32_0 : i32, i32
  }
  func.func @transform_2(%arg0: i32) -> (i32, i32) {
    %c0_i32 = arith.constant 0 : i32
    %c0_i32_0 = arith.constant 0 : i32
    %c0_i32_1 = arith.constant 0 : i32
    return %c0_i32, %c0_i32_0 : i32, i32
  }
  func.func @transform_3(%arg0: i32) -> (i32, i32) {
    %c0_i32 = arith.constant 0 : i32
    %c0_i32_0 = arith.constant 0 : i32
    %c0_i32_1 = arith.constant 0 : i32
    return %c0_i32, %c0_i32_0 : i32, i32
  }
  func.func @transform_4(%arg0: i32) -> (i32, i32) {
    %c0_i32 = arith.constant 0 : i32
    %c0_i32_0 = arith.constant 0 : i32
    %c0_i32_1 = arith.constant 0 : i32
    return %c0_i32, %c0_i32_0 : i32, i32
  }
  func.func @transform_5(%arg0: i32) -> (i32, i32) {
    %c0_i32 = arith.constant 0 : i32
    %c0_i32_0 = arith.constant 0 : i32
    %c0_i32_1 = arith.constant 0 : i32
    return %c0_i32, %c0_i32_0 : i32, i32
  }
  func.func @transform_6(%arg0: i32) -> (i32, i32) {
    %c0_i32 = arith.constant 0 : i32
    %c0_i32_0 = arith.constant 0 : i32
    %c0_i32_1 = arith.constant 0 : i32
    return %c0_i32, %c0_i32_0 : i32, i32
  }
  func.func @transform_7(%arg0: i32) -> (i32, i32, i32) {
    %c0_i32 = arith.constant 0 : i32
    %c0_i32_0 = arith.constant 0 : i32
    %c0_i32_1 = arith.constant 0 : i32
    return %arg0, %c0_i32, %c0_i32_0 : i32, i32, i32
  }
}

</mosaic_0001>

<bundles_post_ra>
// kernel: attention_forward.1
= control target key start
LH: loop header
LB: loop body
LE: loop exit
PB: predicated region body
PF: predicated region fallthrough
CT: control target
= control target key end

     0   :  { %v2686_v2 = vmov 0   ;;  %s3970_s0 = inlined_call_operand.vmem [shape: bf16[2,64,128], index: 0, kind: input, shape index: {}]   ;;  %s3971_s1 = inlined_call_operand.vmem [shape: bf16[128,256], index: 1, kind: input, shape index: {}]   ;;  %s3972_s2 = inlined_call_operand.vmem [shape: f32[1,256], index: 2, kind: input, shape index: {}]   ;;  %s3973_s3 = inlined_call_operand.vmem [shape: f32[9,128], index: 3, kind: input, shape index: {}]   ;;  %s3974_s4 = inlined_call_operand.vmem [shape: f32[1,128], index: 4, kind: input, shape index: {}]   ;;  %s3975_s5 = inlined_call_operand.vmem [shape: bf16[128,128], index: 5, kind: input, shape index: {}]   ;;  %s3976_s6 = inlined_call_operand.vmem [shape: f32[1,128], index: 6, kind: input, shape index: {}]   ;;  %s3977_s7 = inlined_call_operand.hbm [shape: f32[2,64,128], index: 7, kind: output, shape index: {}]  }
   0x1   :  { %v2493_v0 = vld [vmem:[%s3971_s1 + $0x4] ss:$8 sps:$4 sm:$0xff]   ;;  %v2495_v1 = vld [vmem:[%s3971_s1] ss:$8 sps:$4 sm:$0xff]   ;;  %232 = vmatprep.mubr.bf16.mxu0 %v2686_v2  ;;  %v2496_v3 = vld [vmem:[%s3971_s1 + $0x14] ss:$8 sps:$4 sm:$0xff]  }
   0x2   :  { %200 = vmatprep.subr.bf16.mxu0 %v2493_v0  ;;  %v2498_v4 = vld [vmem:[%s3971_s1 + $0x10] ss:$8 sps:$4 sm:$0xff]   ;;  %v2499_v5 = vld [vmem:[%s3971_s1 + $0x24] ss:$8 sps:$4 sm:$0xff]   ;;  %v2501_v6 = vld [vmem:[%s3971_s1 + $0x20] ss:$8 sps:$4 sm:$0xff]  }
   0x3   :  { %201 = vmatpush1.bf16.msra.mxu0 %v2495_v1  ;;  %v2502_v7 = vld [vmem:[%s3971_s1 + $0x34] ss:$8 sps:$4 sm:$0xff]   ;;  %v2504_v8 = vld [vmem:[%s3971_s1 + $0x30] ss:$8 sps:$4 sm:$0xff]   ;;  %v2505_v9 = vld [vmem:[%s3971_s1 + $0x44] ss:$8 sps:$4 sm:$0xff]  }
   0x4   :  { %202 = vmatprep.subr.bf16.mxu0 %v2496_v3  ;;  %v2507_v10 = vld [vmem:[%s3971_s1 + $0x40] ss:$8 sps:$4 sm:$0xff]   ;;  %v2508_v11 = vld [vmem:[%s3971_s1 + $0x54] ss:$8 sps:$4 sm:$0xff]   ;;  %v2510_v12 = vld [vmem:[%s3971_s1 + $0x50] ss:$8 sps:$4 sm:$0xff]  }
   0x5   :  { %v2511_v13 = vld [vmem:[%s3971_s1 + $0x64] ss:$8 sps:$4 sm:$0xff]   ;;  %v2513_v14 = vld [vmem:[%s3971_s1 + $0x60] ss:$8 sps:$4 sm:$0xff]   ;;  %v2514_v15 = vld [vmem:[%s3971_s1 + $0x74] ss:$8 sps:$4 sm:$0xff]  }
   0x7   :  { %203 = vmatpush1.bf16.msra.mxu0 %v2498_v4 }
   0x8   :  { %204 = vmatprep.subr.bf16.mxu0 %v2499_v5 }
   0xb   :  { %205 = vmatpush1.bf16.msra.mxu0 %v2501_v6 }
   0xc   :  { %206 = vmatprep.subr.bf16.mxu0 %v2502_v7 }
   0xf   :  { %207 = vmatpush1.bf16.msra.mxu0 %v2504_v8 }
  0x10   :  { %208 = vmatprep.subr.bf16.mxu0 %v2505_v9 }
  0x13   :  { %209 = vmatpush1.bf16.msra.mxu0 %v2507_v10 }
  0x14   :  { %210 = vmatprep.subr.bf16.mxu0 %v2508_v11 }
  0x17   :  { %211 = vmatpush1.bf16.msra.mxu0 %v2510_v12 }
  0x18   :  { %212 = vmatprep.subr.bf16.mxu0 %v2511_v13 }
  0x19   :  { %12 = vsyncpa [#allocation3], 0  ;;  %v2516_v16 = vld [vmem:[%s3971_s1 + $0x70] ss:$8 sps:$4 sm:$0xff]   ;;  %v2517_v17 = vld [vmem:[%s3970_s0] sm:$0xff]   ;;  %v62_v25 = vlaneseq  ;;  %vm357_vm2 = vcmask 261120  }
  0x1a   :  { %v2518_v18 = vld [vmem:[%s3970_s0 + $0x8] sm:$0xff]   ;;  %v2519_v19 = vld [vmem:[%s3970_s0 + $0x10] sm:$0xff]   ;;  %v2520_v20 = vld [vmem:[%s3970_s0 + $0x18] sm:$0xff]   ;;  %vm447_vm3 = vcmask 523264   ;;  %s2688_s30 = smov 32   ;;  %s2689_s8 = smov 96  }
  0x1b   :  { %213 = vmatpush1.bf16.msra.mxu0 %v2513_v14  ;;  %v2521_v21 = vld [vmem:[%s3970_s0 + $0x20] sm:$0xff]   ;;  %v2522_v22 = vld [vmem:[%s3970_s0 + $0x28] sm:$0xff]   ;;  %v2523_v23 = vld [vmem:[%s3970_s0 + $0x30] sm:$0xff]   ;;  %v2805_v26 = vshrl.u32 %v62_v25, 7 }
  0x1c   :  { %214 = vmatprep.subr.bf16.mxu0 %v2514_v15  ;;  %v2524_v24 = vld [vmem:[%s3970_s0 + $0x38] sm:$0xff]   ;;  %v2811_v28 = vld [vmem:[%s3973_s3] sm:$0xff]  ;;  %s2687_s0 = smov 64  }
  0x1d   :  { %3993 = vst [vmem:[#allocation5_spill] sm:$0xff] %v2805_v26  ;;  %v68_v27 = vsub.s32 1, %v2805_v26  ;;  %v64_v29 = vsub.s32 0, %v2805_v26  ;;  %v60_v30 = vld [vmem:[%s3972_s2] sm:$0x3]  ;;  %v1021_v33 = vsub.s32 2, %v2805_v26 }
  0x1e   :  { %v1041_v41 = vsub.s32 3, %v2805_v26  ;;  %vm335_vm0 = vcmp.ge.s32.totalorder %v2805_v26, 1  ;;  %vm336_vm1 = vcmp.le.s32.totalorder %v2805_v26, 6  ;;  %v1061_v56 = vsub.s32 4, %v2805_v26 }
  0x1f   :  { %215 = vmatpush1.bf16.msra.mxu0 %v2516_v16  ;;  %v2818_v31 = vrot.slane %v2811_v28, %v64_v29  ;;  %v2821_v32 = vrot.slane %v2811_v28, %v68_v27  ;;  %v2824_v34 = vrot.slane %v60_v30, %v68_v27  ;;  %v2826_v35 = vrot.slane %v60_v30, %v64_v29 }
  0x20   :  { %v2829_v37 = vrot.slane %v2811_v28, %v1021_v33  ;;  %v2841_v51 = vrot.slane %v2811_v28, %v1041_v41  ;;  %v1081_v57 = vsub.s32 5, %v2805_v26  ;;  %v2874_v6 = vrot.slane %v2811_v28, %v1061_v56 }
  0x21   :  { %3994 = vst [vmem:[#allocation6_spill] sm:$0xff] %v2818_v31  ;;  %3995 = vst [vmem:[#allocation7_spill] sm:$0xff] %v2821_v32  ;;  %v983_v38 = vmul.f32 0.0, %v2818_v31  ;;  %v1003_v39 = vmul.f32 0.0, %v2821_v32  ;;  %v1121_v25 = vsub.s32 7, %v2805_v26 }
  0x22   :  { %233 = vmatmul.mubr.bf16.vlgmr.msra.gmra.mrb[0].mxu0 %v2517_v17  ;;  %3996 = vst [vmem:[#allocation8_spill] sm:$0xff] %v2829_v37  ;;  %v1023_v50 = vmul.f32 0.0, %v2829_v37  ;;  %3997 = vst [vmem:[#allocation9_spill] sm:$0xff] %v2841_v51  ;;  %v2881_v9 = vrot.slane %v2811_v28, %v1081_v57 }
  0x23   :  { %242 = vmatprep.mubr.bf16.mxu0 %v2686_v2  ;;  %v1011_v49 = vadd.f32 %v1003_v39, %v983_v38  ;;  %3999 = vst [vmem:[#allocation11_spill] sm:$0xff] %v2874_v6 }
  0x24   :  { %4000 = vst [vmem:[#allocation12_spill] sm:$0xff] %v2881_v9 }
  0x25   :  { %v2865_v0 = vadd.f32 %v1023_v50, %v1011_v49 }
  0x27   :  { %3998 = vst [vmem:[#allocation10_spill] sm:$0xff] %v2865_v0 }
  0x2a   :  { %243 = vmatmul.mubr.bf16.gmra.mrb[4].mxu0 %v2518_v18  ;;  %v1101_v18 = vsub.s32 6, %v2805_v26 }
  0x2b   :  { %252 = vmatprep.mubr.bf16.mxu0 %v2686_v2 }
  0x2c   :  { %v2921_v39 = vrot.slane %v2811_v28, %v1101_v18 }
  0x32   :  { %253 = vmatmul.mubr.bf16.gmra.mrb[8].mxu0 %v2519_v19 }
  0x33   :  { %262 = vmatprep.mubr.bf16.mxu0 %v2686_v2 }
  0x3a   :  { %263 = vmatmul.mubr.bf16.gmra.mrb[12].mxu0 %v2520_v20 }
  0x3b   :  { %272 = vmatprep.mubr.bf16.mxu0 %v2686_v2 }
  0x42   :  { %273 = vmatmul.mubr.bf16.gmra.mrb[16].mxu0 %v2521_v21 }
  0x43   :  { %282 = vmatprep.mubr.bf16.mxu0 %v2686_v2 }
  0x4a   :  { %283 = vmatmul.mubr.bf16.gmra.mrb[20].mxu0 %v2522_v22 }
  0x4b   :  { %292 = vmatprep.mubr.bf16.mxu0 %v2686_v2 }
  0x52   :  { %293 = vmatmul.mubr.bf16.gmra.mrb[24].mxu0 %v2523_v23 }
  0x53   :  { %302 = vmatprep.mubr.bf16.mxu0 %v2686_v2 }
  0x5a   :  { %303 = vmatmul.mubr.bf16.gmra.mrb[28].mxu0 %v2524_v24 }
  0xf5   :  { %v234_v36 = vpop.f32.mrb[0].mxu0 }
  0xf6   :  { %v236_v40 = vpop.f32.mrb[1].mxu0  ;;  %v235_v44 = vadd.f32 %v234_v36, %v2826_v35 }
  0xf7   :  { %v237_v42 = vadd.f32 %v236_v40, %v2824_v34  ;;  %v238_v43 = vpop.f32.mrb[2].mxu0 }
  0xf8   :  { %v239_v45 = vadd.f32 %v238_v43, %v2826_v35  ;;  %v240_v46 = vpop.f32.mrb[3].mxu0 }
  0xf9   :  { %v947_v47 = vrot.slane %v237_v42, 7  ;;  %v963_v48 = vrot.slane %v237_v42, 1  ;;  %v2846_v53 = vadd.f32 %v240_v46, %v2824_v34  ;;  %v1004_v59 = vmul.f32 %v2821_v32, %v237_v42 }
  0xfa   :  { %v2843_v52 = vpack.c.bf16 %v239_v45, %v235_v44  ;;  %v1063_v23 = vmul.f32 %v2874_v6, %v237_v42 }
  0xfb   :  { %v955_v54 = vsel %vm335_vm0, %v947_v47, 0.0  ;;  %v971_v55 = vsel %vm336_vm1, %v963_v48, 0.0  ;;  %v948_v60 = vrot.slane %v2846_v53, 7  ;;  %v964_v61 = vrot.slane %v2846_v53, 1 }
  0xfc   :  { %v984_v58 = vmul.f32 %v2818_v31, %v955_v54  ;;  %349 = vrot.lane.b32.xlu0 %v2843_v52, %s2687_s0  ;;  %2318 = vmatprep.mubr.msk.bf16.mxu0 %vm357_vm2, %v2843_v52  ;;  %v2863_v63 = vpack.c.bf16 %v2846_v53, %v237_v42  ;;  %v1024_v2 = vmul.f32 %v2829_v37, %v971_v55 }
  0xfd   :  { %v244_v62 = vpop.f32.mrb[4].mxu0  ;;  %v1043_v3 = vmul.f32 %v2841_v51, %v955_v54  ;;  %v2871_v4 = vsel %vm335_vm0, %v948_v60, 0.0  ;;  %v2894_v17 = vsel %vm336_vm1, %v964_v61, 0.0  ;;  %v1064_v21 = vmul.f32 %v2874_v6, %v2846_v53 }
  0xfe   :  { %v1012_v1 = vadd.f32 %v1004_v59, %v984_v58  ;;  %v246_v5 = vpop.f32.mrb[5].mxu0  ;;  %2326 = vmatprep.subr.bf16.mxu1 %v2863_v63  ;;  %v245_v11 = vadd.f32 %v244_v62, %v2826_v35  ;;  %v1044_v14 = vmul.f32 %v2841_v51, %v2871_v4  ;;  %v1084_v33 = vmul.f32 %v2881_v9, %v2894_v17 }
  0xff   :  { %v2878_v7 = vadd.f32 %v246_v5, %v2824_v34  ;;  %v248_v8 = vpop.f32.mrb[6].mxu0  ;;  %2327 = vmatpush3.bf16.msra.mxu1 %v2863_v63  ;;  %v1051_v22 = vadd.f32 %v1043_v3, %v2865_v0  ;;  %v2930_v47 = vrot.slane %v2811_v28, %v1121_v25  ;;  %v1083_v56 = vmul.f32 %v2881_v9, %v971_v55 }
 0x100   :  { %v1032_v10 = vadd.f32 %v1024_v2, %v1012_v1  ;;  %v249_v12 = vadd.f32 %v248_v8, %v2826_v35  ;;  %v250_v13 = vpop.f32.mrb[7].mxu0  ;;  %v1103_v1 = vmul.f32 %v2921_v39, %v2871_v4  ;;  %v2958_v2 = vld [vmem:[%s3973_s3 + $0x8] ss:$0 sm:$0xff]  ;;  %v985_v25 = vmul.f32 %v2818_v31, %v2871_v4 }
 0x101   :  { %v2889_v15 = vadd.f32 %v250_v13, %v2824_v34  ;;  %v949_v16 = vrot.slane %v2878_v7, 7  ;;  %v965_v29 = vrot.slane %v2878_v7, 1  ;;  %v1071_v42 = vadd.f32 %v1063_v23, %v1051_v22 }
 0x102   :  { %v2897_v19 = vpack.c.bf16 %v249_v12, %v245_v11  ;;  %v1052_v20 = vadd.f32 %v1044_v14, %v1032_v10  ;;  %v1006_v43 = vmul.f32 %v2821_v32, %v2878_v7  ;;  %v1124_v61 = vmul.f32 %v2930_v47, %v2878_v7 }
 0x103   :  { %v2905_v24 = vpack.c.bf16 %v2889_v15, %v2878_v7  ;;  %v2912_v27 = vsel %vm335_vm0, %v949_v16, 0.0  ;;  %v950_v44 = vrot.slane %v2889_v15, 7  ;;  %v2936_v54 = vsel %vm336_vm1, %v965_v29, 0.0 }
 0x104   :  { %351 = vrot.lane.b32.xlu0 %v2897_v19, %s2687_s0  ;;  %v1072_v30 = vadd.f32 %v1064_v21, %v1052_v20  ;;  %v986_v38 = vmul.f32 %v2818_v31, %v2912_v27  ;;  %v1104_v46 = vmul.f32 %v2921_v39, %v2912_v27  ;;  %v1091_v62 = vadd.f32 %v1083_v56, %v1071_v42 }
 0x105   :  { %v254_v36 = vpop.f32.mrb[8].mxu0  ;;  %2328 = vmatprep.subr.bf16.mxu1 %v2905_v24  ;;  %v1026_v3 = vmul.f32 %v2829_v37, %v2936_v54  ;;  %v1144_v8 = vmul.f32 %v2958_v2, %v2936_v54  ;;  %v1123_v11 = vmul.f32 %v2930_v47, %v2846_v53  ;;  %v2970_v12 = vsel %vm335_vm0, %v950_v44, 0.0 }
 0x106   :  { %v256_v40 = vpop.f32.mrb[9].mxu0  ;;  %2329 = vmatpush3.bf16.msra.mxu1 %v2905_v24  ;;  %v1092_v41 = vadd.f32 %v1084_v33, %v1072_v30  ;;  %v255_v48 = vadd.f32 %v254_v36, %v2826_v35  ;;  %v1014_v59 = vadd.f32 %v1006_v43, %v986_v38  ;;  %v1111_v10 = vadd.f32 %v1103_v1, %v1091_v62 }
 0x107   :  { %v258_v45 = vpop.f32.mrb[10].mxu0  ;;  %v2940_v57 = vadd.f32 %v256_v40, %v2824_v34  ;;  %v966_v13 = vrot.slane %v2889_v15, 1  ;;  %v1143_v22 = vmul.f32 %v2958_v2, %v2894_v17  ;;  %v1005_v29 = vmul.f32 %v2821_v32, %v2846_v53 }
 0x108   :  { %v259_v49 = vadd.f32 %v258_v45, %v2826_v35  ;;  %v260_v50 = vpop.f32.mrb[11].mxu0  ;;  %v1112_v28 = vadd.f32 %v1104_v46, %v1092_v41  ;;  %v1034_v16 = vadd.f32 %v1026_v3, %v1014_v59  ;;  %v1131_v21 = vadd.f32 %v1123_v11, %v1111_v10 }
 0x109   :  { %v2943_v58 = vadd.f32 %v260_v50, %v2824_v34  ;;  %v951_v23 = vrot.slane %v2940_v57, 7  ;;  %v1046_v41 = vmul.f32 %v2841_v51, %v2970_v12  ;;  %v967_v4 = vrot.slane %v2940_v57, 1 }
 0x10a   :  { %v2945_v60 = vpack.c.bf16 %v259_v49, %v255_v48  ;;  %v1132_v5 = vadd.f32 %v1124_v61, %v1112_v28  ;;  %v2986_v40 = vadd.f32 %v1143_v22, %v1131_v21  ;;  %v2999_v53 = vsel %vm336_vm1, %v966_v13, 0.0 }
 0x10b   :  { %v2953_v55 = vpack.c.bf16 %v2943_v58, %v2940_v57  ;;  %v959_v45 = vsel %vm335_vm0, %v951_v23, 0.0  ;;  %v1054_v46 = vadd.f32 %v1046_v41, %v1034_v16  ;;  %v1066_v48 = vmul.f32 %v2874_v6, %v2889_v15 }
 0x10c   :  { %353 = vrot.lane.b32.xlu1 %v2945_v60, %s2687_s0  ;;  %v2975_v20 = vadd.f32 %v1144_v8, %v1132_v5  ;;  %v1013_v49 = vadd.f32 %v1005_v29, %v985_v25  ;;  %v1086_v59 = vmul.f32 %v2881_v9, %v2999_v53  ;;  %v1025_v28 = vmul.f32 %v2829_v37, %v2894_v17 }
 0x10d   :  { %v264_v14 = vpop.f32.mrb[12].mxu0  ;;  %2330 = vmatprep.subr.bf16.mxu1 %v2953_v55  ;;  %v1074_v56 = vadd.f32 %v1066_v48, %v1054_v46  ;;  %v1045_v61 = vmul.f32 %v2841_v51, %v2912_v27  ;;  %v988_v62 = vmul.f32 %v2818_v31, %v959_v45  ;;  %v3024_v1 = vsel %vm336_vm1, %v967_v4, 0.0 }
 0x10e   :  { %v266_v18 = vpop.f32.mrb[13].mxu0  ;;  %2331 = vmatpush3.bf16.msra.mxu1 %v2953_v55  ;;  %v265_v33 = vadd.f32 %v264_v14, %v2826_v35  ;;  %v1106_v5 = vmul.f32 %v2921_v39, %v959_v45  ;;  %v1008_v8 = vmul.f32 %v2821_v32, %v2940_v57  ;;  %v952_v10 = vrot.slane %v2943_v58, 7 }
 0x10f   :  { %v268_v30 = vpop.f32.mrb[14].mxu0  ;;  %v2991_v42 = vadd.f32 %v266_v18, %v2824_v34  ;;  %v1094_v3 = vadd.f32 %v1086_v59, %v1074_v56  ;;  %v1033_v11 = vadd.f32 %v1025_v28, %v1013_v49  ;;  %v1126_v16 = vmul.f32 %v2930_v47, %v2940_v57 }
 0x110   :  { %v269_v36 = vadd.f32 %v268_v30, %v2826_v35  ;;  %v270_v38 = vpop.f32.mrb[15].mxu0  ;;  %v987_v21 = vmul.f32 %v2818_v31, %v2970_v12  ;;  %v1016_v23 = vadd.f32 %v1008_v8, %v988_v62  ;;  %v1146_v25 = vmul.f32 %v2958_v2, %v3024_v1 }
 0x111   :  { %v2994_v43 = vadd.f32 %v270_v38, %v2824_v34  ;;  %v1114_v14 = vadd.f32 %v1106_v5, %v1094_v3  ;;  %v953_v18 = vrot.slane %v2991_v42, 7  ;;  %v1053_v29 = vadd.f32 %v1045_v61, %v1033_v11 }
 0x112   :  { %v3001_v44 = vpack.c.bf16 %v269_v36, %v265_v33  ;;  %v1065_v38 = vmul.f32 %v2874_v6, %v2878_v7  ;;  %v1007_v4 = vmul.f32 %v2821_v32, %v2889_v15  ;;  %v3051_v46 = vsel %vm335_vm0, %v952_v10, 0.0 }
 0x113   :  { %v3009_v50 = vpack.c.bf16 %v2994_v43, %v2991_v42  ;;  %v1134_v36 = vadd.f32 %v1126_v16, %v1114_v14  ;;  %v961_v41 = vsel %vm335_vm0, %v953_v18, 0.0  ;;  %v1085_v48 = vmul.f32 %v2881_v9, %v2936_v54 }
 0x114   :  { %355 = vrot.lane.b32.xlu1 %v3001_v44, %s2687_s0  ;;  %v969_v49 = vrot.slane %v2991_v42, 1  ;;  %v1028_v7 = vmul.f32 %v2829_v37, %v3024_v1  ;;  %v1073_v28 = vadd.f32 %v1065_v38, %v1053_v29  ;;  %v1015_v61 = vadd.f32 %v1007_v4, %v987_v21 }
 0x115   :  { %2332 = vmatprep.subr.bf16.mxu1 %v3009_v50  ;;  %v274_v17 = vpop.f32.mrb[16].mxu0  ;;  %v3060_v59 = vadd.f32 %v1146_v25, %v1134_v36  ;;  %v968_v62 = vrot.slane %v2943_v58, 1  ;;  %v1009_v3 = vmul.f32 %v2821_v32, %v2943_v58  ;;  %v990_v8 = vmul.f32 %v2818_v31, %v961_v41 }
 0x116   :  { %2333 = vmatpush3.bf16.msra.mxu1 %v3009_v50  ;;  %v275_v27 = vadd.f32 %v274_v17, %v2826_v35  ;;  %v3031_v13 = vpop.f32.mrb[17].mxu0  ;;  %v989_v54 = vmul.f32 %v2818_v31, %v3051_v46  ;;  %v1010_v10 = vmul.f32 %v2821_v32, %v2991_v42  ;;  %v954_v17 = vrot.slane %v2994_v43, 7 }
 0x117   :  { %v278_v22 = vpop.f32.mrb[18].mxu0  ;;  %v1093_v18 = vadd.f32 %v1085_v48, %v1073_v28  ;;  %v1105_v21 = vmul.f32 %v2921_v39, %v2970_v12  ;;  %v1047_v36 = vmul.f32 %v2841_v51, %v959_v45  ;;  %v970_v38 = vrot.slane %v2994_v43, 1 }
 0x118   :  { %v279_v30 = vadd.f32 %v278_v22, %v2826_v35  ;;  %v3041_v33 = vpop.f32.mrb[19].mxu0  ;;  %v977_v22 = vsel %vm336_vm1, %v969_v49, 0.0  ;;  %v1125_v48 = vmul.f32 %v2930_v47, %v2889_v15  ;;  %v1048_v12 = vmul.f32 %v2841_v51, %v3051_v46 }
 0x119   :  { %v1113_v4 = vadd.f32 %v1105_v21, %v1093_v18  ;;  %v962_v49 = vsel %vm335_vm0, %v954_v17, 0.0  ;;  %v976_v28 = vsel %vm336_vm1, %v968_v62, 0.0  ;;  %v1030_v45 = vmul.f32 %v2829_v37, %v977_v22 }
 0x11a   :  { %v3056_v56 = vpack.c.bf16 %v279_v30, %v275_v27  ;;  %v1036_v27 = vadd.f32 %v1028_v7, %v1016_v23  ;;  %v1027_v30 = vmul.f32 %v2829_v37, %v2999_v53  ;;  %v1018_v23 = vadd.f32 %v1010_v10, %v990_v8 }
 0x11b   :  { %v1145_v8 = vmul.f32 %v2958_v2, %v2999_v53  ;;  %v1068_v15 = vmul.f32 %v2874_v6, %v2943_v58  ;;  %v978_v62 = vsel %vm336_vm1, %v970_v38, 0.0  ;;  %v1070_v53 = vmul.f32 %v2874_v6, %v2994_v43 }
 0x11c   :  { %v1056_v10 = vadd.f32 %v1048_v12, %v1036_v27  ;;  %v1038_v18 = vadd.f32 %v1030_v45, %v1018_v23  ;;  %v1108_v23 = vmul.f32 %v2921_v39, %v961_v41  ;;  %v1029_v45 = vmul.f32 %v2829_v37, %v976_v28 }
 0x11d   :  { %v284_v5 = vpop.f32.mrb[20].mxu0  ;;  %v1148_v37 = vmul.f32 %v2958_v2, %v977_v22 }
 0x11e   :  { %v3071_v11 = vpop.f32.mrb[21].mxu0  ;;  %v285_v14 = vadd.f32 %v284_v5, %v2826_v35  ;;  %v1133_v5 = vadd.f32 %v1125_v48, %v1113_v4  ;;  %v1076_v17 = vadd.f32 %v1068_v15, %v1056_v10  ;;  %v1050_v4 = vmul.f32 %v2841_v51, %v962_v49 }
 0x11f   :  { %v288_v16 = vpop.f32.mrb[22].mxu0  ;;  %v1087_v10 = vmul.f32 %v2881_v9, %v3024_v1 }
 0x120   :  { %v289_v25 = vadd.f32 %v288_v16, %v2826_v35  ;;  %v3079_v29 = vpop.f32.mrb[23].mxu0  ;;  %v1017_v16 = vadd.f32 %v1009_v3, %v989_v54  ;;  %v3100_v0 = vadd.f32 %v1145_v8, %v1133_v5  ;;  %v1049_v5 = vmul.f32 %v2841_v51, %v961_v41 }
 0x121   :  { %v1058_v8 = vadd.f32 %v1050_v4, %v1038_v18  ;;  %v1107_v41 = vmul.f32 %v2921_v39, %v3051_v46  ;;  %v1069_v4 = vmul.f32 %v2874_v6, %v2991_v42  ;;  %v1109_v46 = vmul.f32 %v2921_v39, %v962_v49 }
 0x122   :  { %v3091_v7 = vpack.c.bf16 %v289_v25, %v285_v14  ;;  %v1088_v14 = vmul.f32 %v2881_v9, %v976_v28  ;;  %v1035_v25 = vadd.f32 %v1027_v30, %v1015_v61  ;;  %v1067_v61 = vmul.f32 %v2874_v6, %v2940_v57 }
 0x123   :  { %v1078_v57 = vadd.f32 %v1070_v53, %v1058_v8  ;;  %v1127_v53 = vmul.f32 %v2930_v47, %v2943_v58 }
 0x124   :  { %v1096_v54 = vadd.f32 %v1088_v14, %v1076_v17  ;;  %v1055_v12 = vadd.f32 %v1047_v36, %v1035_v25  ;;  %v1090_v14 = vmul.f32 %v2881_v9, %v978_v62  ;;  %v1037_v25 = vadd.f32 %v1029_v45, %v1017_v16 }
 0x125   :  { %v294_v21 = vpop.f32.mrb[24].mxu0  ;;  %v1089_v16 = vmul.f32 %v2881_v9, %v977_v22 }
 0x126   :  { %v295_v27 = vadd.f32 %v294_v21, %v2826_v35  ;;  %v3109_v48 = vpop.f32.mrb[25].mxu0  ;;  %v1116_v15 = vadd.f32 %v1108_v23, %v1096_v54  ;;  %v1128_v21 = vmul.f32 %v2930_v47, %v2991_v42  ;;  %v1075_v36 = vadd.f32 %v1067_v61, %v1055_v12 }
 0x127   :  { %v298_v3 = vpop.f32.mrb[26].mxu0  ;;  %v3129_v18 = vadd.f32 %v1090_v14, %v1078_v57  ;;  %v1057_v1 = vadd.f32 %v1049_v5, %v1037_v25  ;;  %v1147_v61 = vmul.f32 %v2958_v2, %v976_v28 }
 0x128   :  { %v299_v30 = vadd.f32 %v298_v3, %v2826_v35  ;;  %v3115_v38 = vpop.f32.mrb[27].mxu0  ;;  %v1136_v3 = vadd.f32 %v1128_v21, %v1116_v15  ;;  %v1095_v32 = vadd.f32 %v1087_v10, %v1075_v36 }
 0x129   :  { %v1077_v23 = vadd.f32 %v1069_v4, %v1057_v1 }
 0x12a   :  { %v3123_v17 = vpack.c.bf16 %v299_v30, %v295_v27  ;;  %v3133_v54 = vadd.f32 %v1148_v37, %v1136_v3  ;;  %v1115_v27 = vadd.f32 %v1107_v41, %v1095_v32  ;;  %v1129_v37 = vmul.f32 %v2930_v47, %v2994_v43 }
 0x12b   :  { %v1097_v30 = vadd.f32 %v1089_v16, %v1077_v23  ;;  %v1149_v32 = vmul.f32 %v2958_v2, %v978_v62 }
 0x12c   :  { %v1135_v12 = vadd.f32 %v1127_v53, %v1115_v27 }
 0x12d   :  { %v1117_v5 = vadd.f32 %v1109_v46, %v1097_v30  ;;  %v304_v58 = vpop.f32.mrb[28].mxu0 }
 0x12e   :  { %v3140_v45 = vadd.f32 %v1147_v61, %v1135_v12  ;;  %v305_v22 = vadd.f32 %v304_v58, %v2826_v35  ;;  %v3148_v10 = vpop.f32.mrb[29].mxu0 }
 0x12f   :  { %v1137_v42 = vadd.f32 %v1129_v37, %v1117_v5  ;;  %v308_v28 = vpop.f32.mrb[30].mxu0 }
 0x130   :  { %v309_v15 = vadd.f32 %v308_v28, %v2826_v35  ;;  %v3151_v49 = vpop.f32.mrb[31].mxu0 }
 0x131   :  { %v3145_v8 = vadd.f32 %v1149_v32, %v1137_v42 }
 0x132   :  { %v3153_v21 = vpack.c.bf16 %v309_v15, %v305_v22 }
 0x16e   :  { %v350_v36 = vpop.permute.xlu0 %349 }
 0x16f   :  { %2470 = vmatprep.subr.msk.bf16.mxu0 %vm357_vm2, %v350_v36  ;;  %v371_v43 = vsel %vm357_vm2, %v350_v36, 0 }
 0x170   :  { %2311 = vmatpush3.bf16.xpose.msra.mxu0 %v371_v43 }
 0x176   :  { %v352_v2 = vpop.permute.xlu0 %351 }
 0x177   :  { %2471 = vmatprep.subr.msk.bf16.mxu0 %vm357_vm2, %v352_v2  ;;  %v374_v62 = vsel %vm357_vm2, %v352_v2, 0 }
 0x178   :  { %2313 = vmatpush3.bf16.xpose.msra.mxu0 %v374_v62 }
 0x17e   :  { %v354_v57 = vpop.permute.xlu1 %353 }
 0x17f   :  { %2472 = vmatprep.subr.msk.bf16.mxu0 %vm357_vm2, %v354_v57  ;;  %v377_v35 = vsel %vm357_vm2, %v354_v57, 0 }
 0x180   :  { %2315 = vmatpush3.bf16.xpose.msra.mxu0 %v377_v35 }
 0x186   :  { %v356_v14 = vpop.permute.xlu1 %355 }
 0x187   :  { %2473 = vmatprep.subr.msk.bf16.mxu0 %vm357_vm2, %v356_v14  ;;  %v380_v25 = vsel %vm357_vm2, %v356_v14, 0 }
 0x188   :  { %2317 = vmatpush3.bf16.xpose.msra.mxu0 %v380_v25 }
 0x18f   :  { %2319 = vmatmul.mubr.msk.bf16.vlgmr.msra.gmra.mrb[32].mxu0 %vm357_vm2, %v2897_v19 }
 0x190   :  { %2322 = vmatprep.mubr.msk.bf16.mxu0 %vm357_vm2, %v2945_v60 }
 0x197   :  { %2323 = vmatmul.mubr.msk.bf16.gmra.mrb[36].mxu0 %vm357_vm2, %v3001_v44 }
 0x262   :  { %v2320_v3 = vpop.f32.mrb[32].mxu0 }
 0x263   :  { %v416_v41 = vpop.f32.mrb[33].mxu0  ;;  %v454_v16 = vsel %vm447_vm3, %v2320_v3, -inf }
 0x264   :  { %v2321_v1 = vpop.f32.mrb[34].mxu0  ;;  %v448_v4 = vsel %vm447_vm3, %v416_v41, -inf }
 0x265   :  { %449 = vmax.xlane.f32.xlu0 %v448_v4  ;;  %v419_v27 = vpop.f32.mrb[35].mxu0  ;;  %v457_v30 = vsel %vm447_vm3, %v2321_v1, -inf }
 0x266   :  { %v451_v53 = vsel %vm447_vm3, %v419_v27, -inf }
 0x267   :  { %452 = vmax.xlane.f32.xlu1 %v451_v53 }
 0x269   :  { %455 = vmax.xlane.f32.xlu0 %v454_v16 }
 0x26a   :  { %v3172_v23 = vpop.f32.mrb[36].mxu0 }
 0x26b   :  { %v3174_v12 = vpop.f32.mrb[37].mxu0  ;;  %v466_v37 = vsel %vm447_vm3, %v3172_v23, -inf }
 0x26c   :  { %v2325_v61 = vpop.f32.mrb[38].mxu0  ;;  %v460_v46 = vsel %vm447_vm3, %v3174_v12, -inf }
 0x26d   :  { %458 = vmax.xlane.f32.xlu0 %v457_v30  ;;  %461 = vmax.xlane.f32.xlu1 %v460_v46  ;;  %v435_v5 = vpop.f32.mrb[39].mxu0  ;;  %v469_v32 = vsel %vm447_vm3, %v2325_v61, -inf }
 0x26e   :  { %v463_v42 = vsel %vm447_vm3, %v435_v5, -inf }
 0x271   :  { %467 = vmax.xlane.f32.xlu1 %v466_v37  ;;  %464 = vmax.xlane.f32.xlu0 %v463_v42 }
 0x275   :  { %470 = vmax.xlane.f32.xlu0 %v469_v32 }
 0x2f2   :  { %v450_v58 = vpop.xlane.xlu0 %449 }
 0x2f3   :  { %v472_v22 = vsub.f32 %v416_v41, %v450_v58 }
 0x2f4   :  { %v453_v28 = vpop.xlane.xlu1 %452 }
 0x2f5   :  { %v480_v43 = vmul.f32 1.442695, %v472_v22  ;;  %v473_v2 = vsub.f32 %v419_v27, %v453_v28 }
 0x2f6   :  { %v456_v15 = vpop.xlane.xlu0 %455 }
 0x2f7   :  { %v474_v36 = vsub.f32 %v2320_v3, %v456_v15  ;;  %v482_v14 = vmul.f32 1.442695, %v473_v2 }
 0x2f9   :  { %v484_v62 = vmul.f32 1.442695, %v474_v36 }
 0x2fa   :  { %v459_v57 = vpop.xlane.xlu0 %458  ;;  %v462_v36 = vpop.xlane.xlu1 %461 }
 0x2fb   :  { %2533 = vpow2.f32 %v484_v62  ;;  %v475_v35 = vsub.f32 %v2321_v1, %v459_v57  ;;  %v476_v62 = vsub.f32 %v3174_v12, %v462_v36 }
 0x2fc   :  { %2535 = vpow2.f32 %v480_v43 }
 0x2fd   :  { %v486_v25 = vmul.f32 1.442695, %v475_v35  ;;  %v488_v35 = vmul.f32 1.442695, %v476_v62 }
 0x2fe   :  { %v465_v4 = vpop.xlane.xlu0 %464  ;;  %v468_v43 = vpop.xlane.xlu1 %467 }
 0x2ff   :  { %2537 = vpow2.f32 %v486_v25  ;;  %v477_v53 = vsub.f32 %v435_v5, %v465_v4  ;;  %v478_v2 = vsub.f32 %v3172_v23, %v468_v43 }
 0x300   :  { %2539 = vpow2.f32 %v482_v14 }
 0x301   :  { %v490_v41 = vmul.f32 1.442695, %v477_v53  ;;  %v492_v57 = vmul.f32 1.442695, %v478_v2 }
 0x302   :  { %v471_v16 = vpop.xlane.xlu0 %470 }
 0x303   :  { %v479_v30 = vsub.f32 %v2325_v61, %v471_v16 }
 0x305   :  { %v3183_v46 = vpop.eup %2533  ;;  %v494_v37 = vmul.f32 1.442695, %v479_v30 }
 0x306   :  { %v502_v3 = vsel %vm447_vm3, %v3183_v46, 0.0  ;;  %v3187_v27 = vpop.eup %2535 }
 0x307   :  { %2541 = vpow2.f32 %v494_v37  ;;  %503 = vadd.xlane.f32.xlu1 %v502_v3  ;;  %v496_v42 = vsel %vm447_vm3, %v3187_v27, 0.0 }
 0x308   :  { %2543 = vpow2.f32 %v490_v41 }
 0x309   :  { %v2538_v1 = vpop.eup %2537  ;;  %2545 = vpow2.f32 %v492_v57 }
 0x30a   :  { %v505_v5 = vsel %vm447_vm3, %v2538_v1, 0.0  ;;  %v2540_v32 = vpop.eup %2539  ;;  %2547 = vpow2.f32 %v488_v35 }
 0x30b   :  { %497 = vadd.xlane.f32.xlu1 %v496_v42  ;;  %506 = vadd.xlane.f32.xlu0 %v505_v5  ;;  %v499_v61 = vsel %vm447_vm3, %v2540_v32, 0.0 }
 0x30f   :  { %500 = vadd.xlane.f32.xlu0 %v499_v61 }
 0x311   :  { %v3193_v58 = vpop.eup %2541 }
 0x312   :  { %v517_v22 = vsel %vm447_vm3, %v3193_v58, 0.0  ;;  %v3197_v28 = vpop.eup %2543 }
 0x313   :  { %518 = vadd.xlane.f32.xlu0 %v517_v22  ;;  %v511_v15 = vsel %vm447_vm3, %v3197_v28, 0.0  ;;  %v2546_v23 = vpop.eup %2545 }
 0x314   :  { %v514_v12 = vsel %vm447_vm3, %v2546_v23, 0.0  ;;  %v2548_v14 = vpop.eup %2547 }
 0x315   :  { %v508_v25 = vsel %vm447_vm3, %v2548_v14, 0.0 }
 0x317   :  { %512 = vadd.xlane.f32.xlu0 %v511_v15 }
 0x31c   :  { %625 = vrot.lane.b32.xlu1 %v2843_v52, %s2688_s30 }
 0x32d   :  { %627 = vrot.lane.b32.xlu0 %v2897_v19, %s2688_s30 }
 0x331   :  { %617 = vrot.lane.b32.xlu0 %v2843_v52, %s2689_s8 }
 0x335   :  { %619 = vrot.lane.b32.xlu0 %v2897_v19, %s2689_s8 }
 0x339   :  { %1201 = vrot.lane.b32.xlu0 %v3123_v17, %s2687_s0 }
 0x33d   :  { %623 = vrot.lane.b32.xlu0 %v3001_v44, %s2689_s8 }
 0x340   :  { %515 = vadd.xlane.f32.xlu1 %v514_v12 }
 0x344   :  { %509 = vadd.xlane.f32.xlu1 %v508_v25 }
 0x355   :  { %629 = vrot.lane.b32.xlu1 %v2945_v60, %s2688_s30 }
 0x359   :  { %631 = vrot.lane.b32.xlu1 %v3001_v44, %s2688_s30 }
 0x35d   :  { %1197 = vrot.lane.b32.xlu1 %v3056_v56, %s2687_s0 }
 0x361   :  { %1199 = vrot.lane.b32.xlu1 %v3091_v7, %s2687_s0 }
 0x365   :  { %621 = vrot.lane.b32.xlu1 %v2945_v60, %s2689_s8 }
 0x369   :  { %1203 = vrot.lane.b32.xlu1 %v3153_v21, %s2687_s0 }
 0x36d   :  { %818 = vrot.lane.b32.xlu1 %v2863_v63, %s2687_s0 }
 0x394   :  { %v504_v52 = vpop.xlane.xlu1 %503 }
 0x398   :  { %v498_v19 = vpop.xlane.xlu1 %497  ;;  %v507_v4 = vpop.xlane.xlu0 %506 }
 0x399   :  { %2549 = vrcp.f32 %v507_v4 }
 0x39a   :  { %2551 = vrcp.f32 %v498_v19 }
 0x39b   :  { %2553 = vrcp.f32 %v504_v52 }
 0x39c   :  { %v626_v44 = vpop.permute.xlu1 %625  ;;  %v501_v53 = vpop.xlane.xlu0 %500 }
 0x39d   :  { %2555 = vrcp.f32 %v501_v53  ;;  %2474 = vmatprep.subr.msk.bf16.mxu1 %vm357_vm2, %v626_v44  ;;  %v646_v36 = vsel %vm357_vm2, %v626_v44, 0 }
 0x3a0   :  { %v519_v16 = vpop.xlane.xlu0 %518 }
 0x3a3   :  { %v2550_v30 = vpop.eup %2549 }
 0x3a4   :  { %v2552_v60 = vpop.eup %2551  ;;  %v531_v3 = vmul.f32 %v2550_v30, %v2538_v1  ;;  %v513_v42 = vpop.xlane.xlu0 %512 }
 0x3a5   :  { %v2554_v41 = vpop.eup %2553  ;;  %v528_v63 = vmul.f32 %v2552_v60, %v3187_v27 }
 0x3a6   :  { %v530_v61 = vmul.f32 %v2554_v41, %v3183_v46 }
 0x3a7   :  { %v2556_v37 = vpop.eup %2555 }
 0x3a8   :  { %v529_v5 = vmul.f32 %v2556_v37, %v2540_v32  ;;  %v537_v15 = vpack.c.bf16 %v531_v3, %v530_v61  ;;  %v628_v43 = vpop.permute.xlu0 %627 }
 0x3a9   :  { %v649_v1 = vsel %vm357_vm2, %v628_v43, 0 }
 0x3aa   :  { %v536_v22 = vpack.c.bf16 %v529_v5, %v528_v63 }
 0x3ac   :  { %2334 = vmatprep.mubr.msk.bf16.mxu1 %vm447_vm3, %v536_v22  ;;  %v618_v30 = vpop.permute.xlu0 %617 }
 0x3ad   :  { %2335 = vmatmul.mubr.msk.bf16.vlgmr.msra.gmra.mrb[0].mxu1 %vm447_vm3, %v537_v15 }
 0x3ae   :  { %2343 = vmatpush3.bf16.xpose.msra.mxu1 %v646_v36 }
 0x3af   :  { %2475 = vmatprep.subr.msk.bf16.mxu1 %vm357_vm2, %v628_v43 }
 0x3b6   :  { %2345 = vmatpush3.bf16.xpose.msra.mxu1 %v649_v1 }
 0x3cd   :  { %v516_v2 = vpop.xlane.xlu1 %515 }
 0x3ce   :  { %2557 = vrcp.f32 %v516_v2 }
 0x3cf   :  { %2559 = vrcp.f32 %v513_v42 }
 0x3d0   :  { %2561 = vrcp.f32 %v519_v16 }
 0x3d1   :  { %v510_v46 = vpop.xlane.xlu1 %509 }
 0x3d2   :  { %2563 = vrcp.f32 %v510_v46 }
 0x3d5   :  { %v630_v27 = vpop.permute.xlu1 %629 }
 0x3d6   :  { %v652_v32 = vsel %vm357_vm2, %v630_v27, 0  ;;  %2476 = vmatprep.subr.msk.bf16.mxu1 %vm357_vm2, %v630_v27 }
 0x3d7   :  { %2347 = vmatpush3.bf16.xpose.msra.mxu1 %v652_v32 }
 0x3d8   :  { %v2558_v62 = vpop.eup %2557 }
 0x3d9   :  { %v632_v57 = vpop.permute.xlu1 %631  ;;  %v2560_v35 = vpop.eup %2559  ;;  %v534_v52 = vmul.f32 %v2558_v62, %v2546_v23 }
 0x3da   :  { %2477 = vmatprep.subr.msk.bf16.mxu1 %vm357_vm2, %v632_v57  ;;  %v2562_v12 = vpop.eup %2561  ;;  %v533_v44 = vmul.f32 %v2560_v35, %v3197_v28  ;;  %v655_v53 = vsel %vm357_vm2, %v632_v57, 0  ;;  %v620_v23 = vpop.permute.xlu0 %619 }
 0x3db   :  { %v535_v16 = vmul.f32 %v2562_v12, %v3193_v58 }
 0x3dc   :  { %v2564_v25 = vpop.eup %2563 }
 0x3dd   :  { %v1198_v19 = vpop.permute.xlu1 %1197  ;;  %v532_v4 = vmul.f32 %v2564_v25, %v2548_v14  ;;  %v539_v41 = vpack.c.bf16 %v535_v16, %v534_v52 }
 0x3de   :  { %v1218_v3 = vsel %vm357_vm2, %v1198_v19, 0  ;;  %v1202_v58 = vpop.permute.xlu0 %1201 }
 0x3df   :  { %2349 = vmatpush3.bf16.xpose.msra.mxu1 %v655_v53  ;;  %v538_v60 = vpack.c.bf16 %v533_v44, %v532_v4  ;;  %v1224_v61 = vsel %vm357_vm2, %v1202_v58, 0 }
 0x3e0   :  { %2478 = vmatprep.subr.msk.bf16.mxu1 %vm357_vm2, %v1198_v19 }
 0x3e1   :  { %v1200_v37 = vpop.permute.xlu1 %1199  ;;  %2338 = vmatprep.mubr.msk.bf16.mxu1 %vm447_vm3, %v538_v60 }
 0x3e2   :  { %2339 = vmatmul.mubr.msk.bf16.gmra.mrb[4].mxu1 %vm447_vm3, %v539_v41  ;;  %v624_v63 = vpop.permute.xlu0 %623  ;;  %v1221_v5 = vsel %vm357_vm2, %v1200_v37, 0 }
 0x3e3   :  { %2350 = vmatprep.mubr.msk.bf16.mxu1 %vm357_vm2, %v618_v30 }
 0x3e5   :  { %v622_v14 = vpop.permute.xlu1 %621 }
 0x3e9   :  { %v1204_v28 = vpop.permute.xlu1 %1203 }
 0x3ea   :  { %2351 = vmatmul.mubr.msk.bf16.vlgmr.msra.gmra.mrb[8].mxu1 %vm357_vm2, %v620_v23  ;;  %v1227_v22 = vsel %vm357_vm2, %v1204_v28, 0 }
 0x3eb   :  { %2375 = vmatpush3.bf16.xpose.msra.mxu1 %v1218_v3  ;;  %2354 = vmatprep.mubr.msk.bf16.mxu1 %vm357_vm2, %v622_v14 }
 0x3ec   :  { %2479 = vmatprep.subr.msk.bf16.mxu1 %vm357_vm2, %v1200_v37 }
 0x3ed   :  { %v819_v42 = vpop.permute.xlu1 %818 }
 0x3ee   :  { %2358 = vmatprep.subr.bf16.mxu0 %v819_v42 }
 0x3ef   :  { %2359 = vmatpush3.bf16.msra.mxu0 %v819_v42 }
 0x3f2   :  { %2355 = vmatmul.mubr.msk.bf16.gmra.mrb[12].mxu1 %vm357_vm2, %v624_v63 }
 0x3f3   :  { %2377 = vmatpush3.bf16.xpose.msra.mxu1 %v1221_v5  ;;  %2382 = vmatprep.mubr.msk.bf16.mxu1 %vm357_vm2, %v3056_v56 }
 0x3f4   :  { %2480 = vmatprep.subr.msk.bf16.mxu1 %vm357_vm2, %v1202_v58 }
 0x3fb   :  { %2379 = vmatpush3.bf16.xpose.msra.mxu1 %v1224_v61 }
 0x3fc   :  { %2481 = vmatprep.subr.msk.bf16.mxu1 %vm357_vm2, %v1204_v28 }
 0x403   :  { %2381 = vmatpush3.bf16.xpose.msra.mxu1 %v1227_v22 }
 0x40a   :  { %2383 = vmatmul.mubr.msk.bf16.vlgmr.msra.gmra.mrb[16].mxu1 %vm357_vm2, %v3091_v7 }
 0x40b   :  { %2386 = vmatprep.mubr.msk.bf16.mxu1 %vm357_vm2, %v3123_v17 }
 0x412   :  { %2387 = vmatmul.mubr.msk.bf16.gmra.mrb[20].mxu1 %vm357_vm2, %v3153_v21 }
 0x480   :  { %v3267_v15 = vpop.f32.mrb[0].mxu1 }
 0x481   :  { %v3269_v36 = vpop.f32.mrb[1].mxu1 }
 0x482   :  { %v3271_v43 = vpop.f32.mrb[2].mxu1 }
 0x483   :  { %v3273_v1 = vpop.f32.mrb[3].mxu1 }
 0x4b5   :  { %v3275_v2 = vpop.f32.mrb[4].mxu1 }
 0x4b6   :  { %4001 = vst [vmem:[#allocation13_spill] sm:$0xff] %v3275_v2  ;;  %v3277_v46 = vpop.f32.mrb[5].mxu1 }
 0x4b7   :  { %v3279_v27 = vpop.f32.mrb[6].mxu1 }
 0x4b8   :  { %v3281_v32 = vpop.f32.mrb[7].mxu1 }
 0x4bd   :  { %v2352_v62 = vpop.f32.mrb[8].mxu1 }
 0x4be   :  { %v691_v57 = vpop.f32.mrb[9].mxu1  ;;  %v728_v35 = vsel %vm447_vm3, %v2352_v62, -inf }
 0x4bf   :  { %729 = vmax.xlane.f32.xlu0 %v728_v35  ;;  %v2353_v12 = vpop.f32.mrb[10].mxu1  ;;  %v722_v19 = vsel %vm447_vm3, %v691_v57, -inf }
 0x4c0   :  { %v694_v25 = vpop.f32.mrb[11].mxu1  ;;  %v731_v53 = vsel %vm447_vm3, %v2353_v12, -inf }
 0x4c1   :  { %v725_v52 = vsel %vm447_vm3, %v694_v25, -inf }
 0x4c2   :  { %726 = vmax.xlane.f32.xlu1 %v725_v52 }
 0x4c3   :  { %723 = vmax.xlane.f32.xlu0 %v722_v19 }
 0x4c5   :  { %v3286_v4 = vpop.f32.mrb[12].mxu1 }
 0x4c6   :  { %v707_v44 = vpop.f32.mrb[13].mxu1  ;;  %v740_v16 = vsel %vm447_vm3, %v3286_v4, -inf }
 0x4c7   :  { %732 = vmax.xlane.f32.xlu0 %v731_v53  ;;  %741 = vmax.xlane.f32.xlu1 %v740_v16  ;;  %v3291_v30 = vpop.f32.mrb[14].mxu1  ;;  %v734_v41 = vsel %vm447_vm3, %v707_v44, -inf }
 0x4c8   :  { %v3293_v60 = vpop.f32.mrb[15].mxu1  ;;  %v743_v37 = vsel %vm447_vm3, %v3291_v30, -inf }
 0x4c9   :  { %v737_v23 = vsel %vm447_vm3, %v3293_v60, -inf }
 0x4cb   :  { %735 = vmax.xlane.f32.xlu1 %v734_v41  ;;  %744 = vmax.xlane.f32.xlu0 %v743_v37 }
 0x4cf   :  { %738 = vmax.xlane.f32.xlu0 %v737_v23 }
 0x4dd   :  { %v3300_v14 = vpop.f32.mrb[16].mxu1 }
 0x4de   :  { %v3302_v28 = vpop.f32.mrb[17].mxu1  ;;  %v1300_v3 = vsel %vm447_vm3, %v3300_v14, -inf }
 0x4df   :  { %1301 = vmax.xlane.f32.xlu1 %v1300_v3  ;;  %v3306_v58 = vpop.f32.mrb[18].mxu1  ;;  %v1294_v5 = vsel %vm447_vm3, %v3302_v28, -inf }
 0x4e0   :  { %v3308_v42 = vpop.f32.mrb[19].mxu1  ;;  %v1303_v63 = vsel %vm447_vm3, %v3306_v58, -inf }
 0x4e1   :  { %1304 = vmax.xlane.f32.xlu0 %v1303_v63  ;;  %v1297_v61 = vsel %vm447_vm3, %v3308_v42, -inf }
 0x4e3   :  { %1295 = vmax.xlane.f32.xlu1 %v1294_v5 }
 0x4e5   :  { %v3316_v22 = vpop.f32.mrb[20].mxu1  ;;  %1298 = vmax.xlane.f32.xlu0 %v1297_v61 }
 0x4e6   :  { %v3318_v35 = vpop.f32.mrb[21].mxu1  ;;  %v1312_v52 = vsel %vm447_vm3, %v3316_v22, -inf }
 0x4e7   :  { %1313 = vmax.xlane.f32.xlu1 %v1312_v52  ;;  %v3322_v19 = vpop.f32.mrb[22].mxu1  ;;  %v1306_v41 = vsel %vm447_vm3, %v3318_v35, -inf }
 0x4e8   :  { %v3324_v53 = vpop.f32.mrb[23].mxu1  ;;  %v1315_v16 = vsel %vm447_vm3, %v3322_v19, -inf }
 0x4e9   :  { %1316 = vmax.xlane.f32.xlu0 %v1315_v16  ;;  %v1309_v37 = vsel %vm447_vm3, %v3324_v53, -inf }
 0x4eb   :  { %1307 = vmax.xlane.f32.xlu1 %v1306_v41 }
 0x4ed   :  { %1310 = vmax.xlane.f32.xlu0 %v1309_v37 }
 0x4fc   :  { %822 = vrot.lane.b32.xlu1 %v2953_v55, %s2687_s0 }
 0x503   :  { %820 = vrot.lane.b32.xlu0 %v2905_v24, %s2687_s0 }
 0x54c   :  { %v730_v23 = vpop.xlane.xlu0 %729 }
 0x54d   :  { %v748_v3 = vsub.f32 %v2352_v62, %v730_v23 }
 0x54f   :  { %v758_v63 = vmul.f32 1.442695, %v748_v3  ;;  %v727_v5 = vpop.xlane.xlu1 %726 }
 0x550   :  { %v724_v61 = vpop.xlane.xlu0 %723  ;;  %v747_v9 = vsub.f32 %v694_v25, %v727_v5 }
 0x551   :  { %2565 = vpow2.f32 %v758_v63  ;;  %v746_v52 = vsub.f32 %v691_v57, %v724_v61 }
 0x552   :  { %v756_v31 = vmul.f32 1.442695, %v747_v9 }
 0x553   :  { %v754_v16 = vmul.f32 1.442695, %v746_v52 }
 0x554   :  { %v742_v41 = vpop.xlane.xlu1 %741  ;;  %v733_v6 = vpop.xlane.xlu0 %732 }
 0x555   :  { %2567 = vpow2.f32 %v754_v16  ;;  %v749_v51 = vsub.f32 %v2353_v12, %v733_v6  ;;  %v752_v55 = vsub.f32 %v3286_v4, %v742_v41 }
 0x557   :  { %v760_v37 = vmul.f32 1.442695, %v749_v51  ;;  %v766_v3 = vmul.f32 1.442695, %v752_v55 }
 0x558   :  { %v736_v26 = vpop.xlane.xlu1 %735  ;;  %v745_v2 = vpop.xlane.xlu0 %744 }
 0x559   :  { %v750_v24 = vsub.f32 %v707_v44, %v736_v26  ;;  %2569 = vpow2.f32 %v760_v37  ;;  %v753_v57 = vsub.f32 %v3291_v30, %v745_v2 }
 0x55a   :  { %2571 = vpow2.f32 %v756_v31 }
 0x55b   :  { %v3337_v62 = vpop.eup %2565  ;;  %v762_v23 = vmul.f32 1.442695, %v750_v24  ;;  %v768_v9 = vmul.f32 1.442695, %v753_v57 }
 0x55c   :  { %v776_v25 = vsel %vm447_vm3, %v3337_v62, 0.0  ;;  %v739_v6 = vpop.xlane.xlu0 %738 }
 0x55d   :  { %2573 = vpow2.f32 %v762_v23  ;;  %777 = vadd.xlane.f32.xlu1 %v776_v25  ;;  %v751_v26 = vsub.f32 %v3293_v60, %v739_v6 }
 0x55e   :  { %2575 = vpow2.f32 %v766_v3 }
 0x55f   :  { %v3342_v51 = vpop.eup %2567  ;;  %2577 = vpow2.f32 %v768_v9  ;;  %v764_v2 = vmul.f32 1.442695, %v751_v26 }
 0x560   :  { %v770_v12 = vsel %vm447_vm3, %v3342_v51, 0.0 }
 0x561   :  { %771 = vadd.xlane.f32.xlu1 %v770_v12  ;;  %2579 = vpow2.f32 %v764_v2 }
 0x563   :  { %v3347_v31 = vpop.eup %2569 }
 0x564   :  { %v779_v4 = vsel %vm447_vm3, %v3347_v31, 0.0  ;;  %v3351_v44 = vpop.eup %2571 }
 0x565   :  { %780 = vadd.xlane.f32.xlu0 %v779_v4  ;;  %v773_v63 = vsel %vm447_vm3, %v3351_v44, 0.0 }
 0x567   :  { %v3353_v30 = vpop.eup %2573 }
 0x568   :  { %v782_v60 = vsel %vm447_vm3, %v3353_v30, 0.0  ;;  %v3359_v5 = vpop.eup %2575 }
 0x569   :  { %783 = vadd.xlane.f32.xlu1 %v782_v60  ;;  %774 = vadd.xlane.f32.xlu0 %v773_v63  ;;  %v788_v16 = vsel %vm447_vm3, %v3359_v5, 0.0  ;;  %v3364_v41 = vpop.eup %2577 }
 0x56a   :  { %v791_v57 = vsel %vm447_vm3, %v3364_v41, 0.0 }
 0x56b   :  { %v3370_v25 = vpop.eup %2579 }
 0x56c   :  { %v1302_v61 = vpop.xlane.xlu1 %1301  ;;  %v785_v4 = vsel %vm447_vm3, %v3370_v25, 0.0 }
 0x56d   :  { %v1320_v52 = vsub.f32 %v3300_v14, %v1302_v61  ;;  %789 = vadd.xlane.f32.xlu0 %v788_v16 }
 0x56e   :  { %v1305_v37 = vpop.xlane.xlu0 %1304 }
 0x56f   :  { %v1330_v55 = vmul.f32 1.442695, %v1320_v52  ;;  %v1321_v24 = vsub.f32 %v3306_v58, %v1305_v37 }
 0x570   :  { %v1296_v23 = vpop.xlane.xlu1 %1295 }
 0x571   :  { %2581 = vpow2.f32 %v1330_v55  ;;  %v1318_v3 = vsub.f32 %v3302_v28, %v1296_v23  ;;  %v1332_v14 = vmul.f32 1.442695, %v1321_v24  ;;  %792 = vadd.xlane.f32.xlu0 %v791_v57 }
 0x572   :  { %v1299_v6 = vpop.xlane.xlu0 %1298 }
 0x573   :  { %v1326_v9 = vmul.f32 1.442695, %v1318_v3  ;;  %v1319_v26 = vsub.f32 %v3308_v42, %v1299_v6 }
 0x574   :  { %v1314_v12 = vpop.xlane.xlu1 %1313 }
 0x575   :  { %2583 = vpow2.f32 %v1326_v9  ;;  %v1328_v2 = vmul.f32 1.442695, %v1319_v26  ;;  %v1324_v58 = vsub.f32 %v3316_v22, %v1314_v12  ;;  %786 = vadd.xlane.f32.xlu0 %v785_v4 }
 0x576   :  { %2585 = vpow2.f32 %v1332_v14  ;;  %v1317_v28 = vpop.xlane.xlu0 %1316 }
 0x577   :  { %2587 = vpow2.f32 %v1328_v2  ;;  %v1338_v60 = vmul.f32 1.442695, %v1324_v58  ;;  %v1325_v42 = vsub.f32 %v3322_v19, %v1317_v28 }
 0x578   :  { %v1308_v63 = vpop.xlane.xlu1 %1307 }
 0x579   :  { %v1322_v61 = vsub.f32 %v3318_v35, %v1308_v63  ;;  %2589 = vpow2.f32 %v1338_v60  ;;  %v1340_v23 = vmul.f32 1.442695, %v1325_v42 }
 0x57a   :  { %v1311_v52 = vpop.xlane.xlu0 %1310 }
 0x57b   :  { %v3377_v16 = vpop.eup %2581  ;;  %v1334_v37 = vmul.f32 1.442695, %v1322_v61  ;;  %v1323_v3 = vsub.f32 %v3324_v53, %v1311_v52 }
 0x57c   :  { %v1348_v22 = vsel %vm447_vm3, %v3377_v16, 0.0  ;;  %v823_v57 = vpop.permute.xlu1 %822 }
 0x57d   :  { %1349 = vadd.xlane.f32.xlu1 %v1348_v22  ;;  %2591 = vpow2.f32 %v1334_v37  ;;  %v1336_v9 = vmul.f32 1.442695, %v1323_v3 }
 0x57e   :  { %v821_v55 = vpop.permute.xlu0 %820  ;;  %2593 = vpow2.f32 %v1340_v23 }
 0x57f   :  { %v3382_v24 = vpop.eup %2583  ;;  %2360 = vmatprep.subr.bf16.mxu0 %v821_v55  ;;  %2595 = vpow2.f32 %v1336_v9 }
 0x580   :  { %v3385_v35 = vpop.eup %2585  ;;  %2361 = vmatpush3.bf16.msra.mxu0 %v821_v55  ;;  %v1342_v19 = vsel %vm447_vm3, %v3382_v24, 0.0 }
 0x581   :  { %v3389_v14 = vpop.eup %2587  ;;  %1343 = vadd.xlane.f32.xlu1 %v1342_v19  ;;  %2362 = vmatprep.subr.bf16.mxu0 %v823_v57  ;;  %v1351_v53 = vsel %vm447_vm3, %v3385_v35, 0.0 }
 0x582   :  { %v1345_v6 = vsel %vm447_vm3, %v3389_v14, 0.0 }
 0x583   :  { %1346 = vadd.xlane.f32.xlu0 %v1345_v6  ;;  %v3395_v26 = vpop.eup %2589 }
 0x584   :  { %2363 = vmatpush3.bf16.msra.mxu0 %v823_v57  ;;  %v1360_v12 = vsel %vm447_vm3, %v3395_v26, 0.0 }
 0x585   :  { %1352 = vadd.xlane.f32.xlu1 %v1351_v53 }
 0x587   :  { %v3399_v2 = vpop.eup %2591 }
 0x588   :  { %v1354_v58 = vsel %vm447_vm3, %v3399_v2, 0.0  ;;  %v3403_v4 = vpop.eup %2593 }
 0x589   :  { %1361 = vadd.xlane.f32.xlu1 %v1360_v12  ;;  %v1363_v28 = vsel %vm447_vm3, %v3403_v4, 0.0  ;;  %v3407_v60 = vpop.eup %2595 }
 0x58a   :  { %v1357_v63 = vsel %vm447_vm3, %v3407_v60, 0.0 }
 0x58d   :  { %1355 = vadd.xlane.f32.xlu1 %v1354_v58  ;;  %v3434_v58 = vadd.f32 %v3031_v13, %v2824_v34 }
 0x591   :  { %1364 = vadd.xlane.f32.xlu1 %v1363_v28  ;;  %v3438_v28 = vadd.f32 %v3041_v33, %v2824_v34  ;;  %v3450_v33 = vadd.f32 %v3071_v11, %v2824_v34 }
 0x595   :  { %1358 = vadd.xlane.f32.xlu1 %v1357_v63 }
 0x599   :  { %824 = vrot.lane.b32.xlu0 %v3009_v50, %s2687_s0 }
 0x59d   :  { %1473 = vrot.lane.b32.xlu0 %v3091_v7, %s2688_s30 }
 0x5a1   :  { %1475 = vrot.lane.b32.xlu0 %v3123_v17, %s2688_s30 }
 0x5a5   :  { %1477 = vrot.lane.b32.xlu0 %v3153_v21, %s2688_s30 }
 0x5a6   :  { %1471 = vrot.lane.b32.xlu1 %v3056_v56, %s2688_s30 }
 0x5a9   :  { %1463 = vrot.lane.b32.xlu0 %v3056_v56, %s2689_s8 }
 0x5aa   :  { %1465 = vrot.lane.b32.xlu1 %v3091_v7, %s2689_s8 }
 0x5ad   :  { %1467 = vrot.lane.b32.xlu0 %v3123_v17, %s2689_s8 }
 0x5ae   :  { %1469 = vrot.lane.b32.xlu1 %v3153_v21, %s2689_s8 }
 0x5ea   :  { %v778_v50 = vpop.xlane.xlu1 %777 }
 0x5ee   :  { %v772_v61 = vpop.xlane.xlu1 %771 }
 0x5ef   :  { %2597 = vrcp.f32 %v772_v61 }
 0x5f2   :  { %v781_v52 = vpop.xlane.xlu0 %780 }
 0x5f6   :  { %v775_v42 = vpop.xlane.xlu0 %774  ;;  %v784_v17 = vpop.xlane.xlu1 %783 }
 0x5f7   :  { %2599 = vrcp.f32 %v775_v42  ;;  %v3445_v42 = vpack.c.bf16 %v3438_v28, %v3434_v58 }
 0x5f8   :  { %2601 = vrcp.f32 %v781_v52 }
 0x5f9   :  { %v2598_v55 = vpop.eup %2597 }
 0x5fa   :  { %v790_v37 = vpop.xlane.xlu0 %789  ;;  %v802_v56 = vmul.f32 %v2598_v55, %v3342_v51 }
 0x5fe   :  { %v793_v22 = vpop.xlane.xlu0 %792 }
 0x601   :  { %v2600_v23 = vpop.eup %2599 }
 0x602   :  { %v803_v7 = vmul.f32 %v2600_v23, %v3351_v44  ;;  %v787_v3 = vpop.xlane.xlu0 %786  ;;  %v2602_v6 = vpop.eup %2601 }
 0x603   :  { %2603 = vrcp.f32 %v787_v3  ;;  %v805_v63 = vmul.f32 %v2602_v6, %v3347_v31  ;;  %v3454_v31 = vadd.f32 %v3079_v29, %v2824_v34 }
 0x604   :  { %v810_v57 = vpack.c.bf16 %v803_v7, %v802_v56  ;;  %2605 = vrcp.f32 %v778_v50  ;;  %v3466_v56 = vadd.f32 %v3109_v48, %v2824_v34  ;;  %v3470_v7 = vadd.f32 %v3115_v38, %v2824_v34 }
 0x605   :  { %2607 = vrcp.f32 %v784_v17  ;;  %v3484_v38 = vadd.f32 %v3148_v10, %v2824_v34 }
 0x606   :  { %2366 = vmatprep.mubr.msk.bf16.mxu0 %vm447_vm3, %v810_v57  ;;  %2609 = vrcp.f32 %v793_v22  ;;  %v3477_v17 = vpack.c.bf16 %v3470_v7, %v3466_v56 }
 0x607   :  { %2611 = vrcp.f32 %v790_v37 }
 0x60a   :  { %v1350_v21 = vpop.xlane.xlu1 %1349 }
 0x60d   :  { %v2604_v53 = vpop.eup %2603 }
 0x60e   :  { %v1344_v19 = vpop.xlane.xlu1 %1343  ;;  %v2606_v51 = vpop.eup %2605  ;;  %v807_v61 = vmul.f32 %v2604_v53, %v3370_v25 }
 0x60f   :  { %2613 = vrcp.f32 %v1344_v19  ;;  %v2608_v12 = vpop.eup %2607  ;;  %v804_v52 = vmul.f32 %v2606_v51, %v3337_v62 }
 0x610   :  { %v1347_v9 = vpop.xlane.xlu0 %1346  ;;  %v806_v13 = vmul.f32 %v2608_v12, %v3353_v30  ;;  %v2610_v62 = vpop.eup %2609  ;;  %v3460_v30 = vpack.c.bf16 %v3454_v31, %v3450_v33 }
 0x611   :  { %2615 = vrcp.f32 %v1347_v9  ;;  %v811_v25 = vpack.c.bf16 %v805_v63, %v804_v52  ;;  %v2612_v55 = vpop.eup %2611  ;;  %v809_v3 = vmul.f32 %v2610_v62, %v3364_v41  ;;  %v3488_v41 = vadd.f32 %v3151_v49, %v2824_v34 }
 0x612   :  { %v1353_v44 = vpop.xlane.xlu1 %1352  ;;  %v812_v22 = vpack.c.bf16 %v807_v61, %v806_v13 }
 0x613   :  { %2617 = vrcp.f32 %v1353_v44 }
 0x614   :  { %v825_v50 = vpop.permute.xlu0 %824  ;;  %2619 = vrcp.f32 %v1350_v21  ;;  %v808_v21 = vmul.f32 %v2612_v55, %v3359_v5 }
 0x615   :  { %2364 = vmatprep.subr.bf16.mxu0 %v825_v50 }
 0x616   :  { %v1362_v37 = vpop.xlane.xlu1 %1361  ;;  %2365 = vmatpush3.bf16.msra.mxu0 %v825_v50 }
 0x617   :  { %2390 = vmatprep.subr.bf16.mxu0 %v3445_v42 }
 0x618   :  { %v1474_v5 = vpop.permute.xlu0 %1473 }
 0x619   :  { %2367 = vmatmul.mubr.msk.bf16.vlgmr.msra.gmra.mrb[40].mxu0 %vm447_vm3, %v811_v25  ;;  %v2614_v23 = vpop.eup %2613 }
 0x61a   :  { %v1356_v11 = vpop.xlane.xlu1 %1355  ;;  %2370 = vmatprep.mubr.msk.bf16.mxu0 %vm447_vm3, %v812_v22  ;;  %2391 = vmatpush3.bf16.msra.mxu0 %v3445_v42  ;;  %v1374_v48 = vmul.f32 %v2614_v23, %v3382_v24  ;;  %v3494_v24 = vpack.c.bf16 %v3488_v41, %v3484_v38 }
 0x61b   :  { %v2616_v29 = vpop.eup %2615  ;;  %2392 = vmatprep.subr.bf16.mxu0 %v3460_v30 }
 0x61c   :  { %v1375_v57 = vmul.f32 %v2616_v29, %v3389_v14  ;;  %v813_v14 = vpack.c.bf16 %v809_v3, %v808_v21  ;;  %v1476_v12 = vpop.permute.xlu0 %1475 }
 0x61d   :  { %v2618_v6 = vpop.eup %2617 }
 0x61e   :  { %v1365_v19 = vpop.xlane.xlu1 %1364  ;;  %2393 = vmatpush3.bf16.msra.mxu0 %v3460_v30  ;;  %v1382_v9 = vpack.c.bf16 %v1375_v57, %v1374_v48  ;;  %v2620_v10 = vpop.eup %2619  ;;  %v1377_v34 = vmul.f32 %v2618_v6, %v3385_v35 }
 0x61f   :  { %2394 = vmatprep.subr.bf16.mxu0 %v3477_v17  ;;  %2621 = vrcp.f32 %v1365_v19  ;;  %v1376_v49 = vmul.f32 %v2620_v10, %v3377_v16 }
 0x620   :  { %2623 = vrcp.f32 %v1356_v11 }
 0x621   :  { %2371 = vmatmul.mubr.msk.bf16.gmra.mrb[44].mxu0 %vm447_vm3, %v813_v14  ;;  %2625 = vrcp.f32 %v1362_v37  ;;  %v1383_v44 = vpack.c.bf16 %v1377_v34, %v1376_v49  ;;  %v1478_v37 = vpop.permute.xlu0 %1477 }
 0x622   :  { %v1359_v53 = vpop.xlane.xlu1 %1358  ;;  %2395 = vmatpush3.bf16.msra.mxu0 %v3477_v17  ;;  %2398 = vmatprep.mubr.msk.bf16.mxu0 %vm447_vm3, %v1382_v9 }
 0x623   :  { %2627 = vrcp.f32 %v1359_v53  ;;  %2396 = vmatprep.subr.bf16.mxu0 %v3494_v24 }
 0x625   :  { %v1464_v23 = vpop.permute.xlu0 %1463 }
 0x626   :  { %v1472_v51 = vpop.permute.xlu1 %1471  ;;  %2397 = vmatpush3.bf16.msra.mxu0 %v3494_v24 }
 0x627   :  { %2482 = vmatprep.subr.msk.bf16.mxu0 %vm357_vm2, %v1472_v51  ;;  %v1492_v13 = vsel %vm357_vm2, %v1472_v51, 0 }
 0x629   :  { %2399 = vmatmul.mubr.msk.bf16.vlgmr.msra.gmra.mrb[48].mxu0 %vm447_vm3, %v1383_v44  ;;  %v2622_v63 = vpop.eup %2621  ;;  %v1468_v11 = vpop.permute.xlu0 %1467 }
 0x62a   :  { %v2624_v50 = vpop.eup %2623  ;;  %v1381_v35 = vmul.f32 %v2622_v63, %v3403_v4  ;;  %v1495_v4 = vsel %vm357_vm2, %v1474_v5, 0 }
 0x62b   :  { %v2626_v61 = vpop.eup %2625  ;;  %v1378_v16 = vmul.f32 %v2624_v50, %v3399_v2  ;;  %v1498_v2 = vsel %vm357_vm2, %v1476_v12, 0 }
 0x62c   :  { %v1380_v62 = vmul.f32 %v2626_v61, %v3395_v26  ;;  %v1501_v26 = vsel %vm357_vm2, %v1478_v37, 0 }
 0x62d   :  { %v2628_v52 = vpop.eup %2627 }
 0x62e   :  { %v1379_v25 = vmul.f32 %v2628_v52, %v3407_v60  ;;  %v1385_v55 = vpack.c.bf16 %v1381_v35, %v1380_v62  ;;  %v1466_v60 = vpop.permute.xlu1 %1465 }
 0x62f   :  { %2407 = vmatpush3.bf16.xpose.msra.mxu0 %v1492_v13 }
 0x630   :  { %2483 = vmatprep.subr.msk.bf16.mxu0 %vm357_vm2, %v1474_v5  ;;  %v1384_v22 = vpack.c.bf16 %v1379_v25, %v1378_v16 }
 0x632   :  { %2402 = vmatprep.mubr.msk.bf16.mxu0 %vm447_vm3, %v1384_v22  ;;  %v1470_v29 = vpop.permute.xlu1 %1469 }
 0x633   :  { %2403 = vmatmul.mubr.msk.bf16.gmra.mrb[52].mxu0 %vm447_vm3, %v1385_v55 }
 0x634   :  { %2414 = vmatprep.mubr.msk.bf16.mxu0 %vm357_vm2, %v1464_v23 }
 0x637   :  { %2409 = vmatpush3.bf16.xpose.msra.mxu0 %v1495_v4 }
 0x638   :  { %2484 = vmatprep.subr.msk.bf16.mxu0 %vm357_vm2, %v1476_v12 }
 0x63f   :  { %2411 = vmatpush3.bf16.xpose.msra.mxu0 %v1498_v2 }
 0x640   :  { %2485 = vmatprep.subr.msk.bf16.mxu0 %vm357_vm2, %v1478_v37 }
 0x647   :  { %2413 = vmatpush3.bf16.xpose.msra.mxu0 %v1501_v26 }
 0x64e   :  { %2415 = vmatmul.mubr.msk.bf16.vlgmr.msra.gmra.mrb[56].mxu0 %vm357_vm2, %v1466_v60 }
 0x64f   :  { %2418 = vmatprep.mubr.msk.bf16.mxu0 %vm357_vm2, %v1468_v11 }
 0x656   :  { %2419 = vmatmul.mubr.msk.bf16.gmra.mrb[60].mxu0 %vm357_vm2, %v1470_v29 }
 0x6ec   :  { %v3521_v3 = vpop.f32.mrb[40].mxu0 }
 0x6ed   :  { %v3523_v57 = vpop.f32.mrb[41].mxu0 }
 0x6ee   :  { %v3525_v21 = vpop.f32.mrb[42].mxu0 }
 0x6ef   :  { %v3527_v19 = vpop.f32.mrb[43].mxu0 }
 0x6f4   :  { %v3529_v48 = vpop.f32.mrb[44].mxu0 }
 0x6f5   :  { %v3531_v14 = vpop.f32.mrb[45].mxu0 }
 0x6f6   :  { %v3533_v6 = vpop.f32.mrb[46].mxu0 }
 0x6f7   :  { %v3535_v9 = vpop.f32.mrb[47].mxu0 }
 0x6fc   :  { %v3537_v5 = vpop.f32.mrb[48].mxu0 }
 0x6fd   :  { %4002 = vst [vmem:[#allocation14_spill] sm:$0xff] %v3537_v5  ;;  %v3539_v10 = vpop.f32.mrb[49].mxu0 }
 0x6fe   :  { %v3541_v53 = vpop.f32.mrb[50].mxu0 }
 0x6ff   :  { %4003 = vst [vmem:[#allocation15_spill] sm:$0xff] %v3541_v53  ;;  %v3543_v34 = vpop.f32.mrb[51].mxu0 }
 0x706   :  { %v3545_v49 = vpop.f32.mrb[52].mxu0 }
 0x707   :  { %4004 = vst [vmem:[#allocation16_spill] sm:$0xff] %v3545_v49  ;;  %v3547_v51 = vpop.f32.mrb[53].mxu0 }
 0x708   :  { %4005 = vst [vmem:[#allocation17_spill] sm:$0xff] %v3547_v51  ;;  %v3549_v44 = vpop.f32.mrb[54].mxu0 }
 0x709   :  { %4006 = vst [vmem:[#allocation18_spill] sm:$0xff] %v3549_v44  ;;  %v3551_v12 = vpop.f32.mrb[55].mxu0 }
 0x70a   :  { %4007 = vst [vmem:[#allocation19_spill] sm:$0xff] %v3551_v12 }
 0x721   :  { %v2416_v63 = vpop.f32.mrb[56].mxu0 }
 0x722   :  { %v1537_v50 = vpop.f32.mrb[57].mxu0  ;;  %v1574_v13 = vsel %vm447_vm3, %v2416_v63, -inf }
 0x723   :  { %v2417_v61 = vpop.f32.mrb[58].mxu0  ;;  %v1568_v52 = vsel %vm447_vm3, %v1537_v50, -inf }
 0x724   :  { %1569 = vmax.xlane.f32.xlu0 %v1568_v52  ;;  %v1540_v37 = vpop.f32.mrb[59].mxu0  ;;  %v1577_v22 = vsel %vm447_vm3, %v2417_v61, -inf }
 0x725   :  { %v1571_v35 = vsel %vm447_vm3, %v1540_v37, -inf }
 0x726   :  { %1572 = vmax.xlane.f32.xlu1 %v1571_v35 }
 0x728   :  { %1575 = vmax.xlane.f32.xlu0 %v1574_v13 }
 0x729   :  { %v2420_v16 = vpop.f32.mrb[60].mxu0 }
 0x72a   :  { %v1553_v25 = vpop.f32.mrb[61].mxu0  ;;  %v1586_v4 = vsel %vm447_vm3, %v2420_v16, -inf }
 0x72b   :  { %v2421_v62 = vpop.f32.mrb[62].mxu0  ;;  %v1580_v55 = vsel %vm447_vm3, %v1553_v25, -inf }
 0x72c   :  { %1578 = vmax.xlane.f32.xlu0 %v1577_v22  ;;  %1581 = vmax.xlane.f32.xlu1 %v1580_v55  ;;  %v1556_v23 = vpop.f32.mrb[63].mxu0  ;;  %v1589_v26 = vsel %vm447_vm3, %v2421_v62, -inf }
 0x72d   :  { %v1583_v2 = vsel %vm447_vm3, %v1556_v23, -inf }
 0x730   :  { %1587 = vmax.xlane.f32.xlu1 %v1586_v4  ;;  %1584 = vmax.xlane.f32.xlu0 %v1583_v2 }
 0x734   :  { %1590 = vmax.xlane.f32.xlu0 %v1589_v26 }
 0x741   :  { %1664 = vrot.lane.b32.xlu1 %v3445_v42, %s2687_s0 }
 0x7b1   :  { %v1570_v60 = vpop.xlane.xlu0 %1569 }
 0x7b2   :  { %v1592_v11 = vsub.f32 %v1537_v50, %v1570_v60 }
 0x7b3   :  { %v1573_v29 = vpop.xlane.xlu1 %1572 }
 0x7b4   :  { %v1600_v13 = vmul.f32 1.442695, %v1592_v11  ;;  %v1593_v55 = vsub.f32 %v1540_v37, %v1573_v29 }
 0x7b5   :  { %v1576_v52 = vpop.xlane.xlu0 %1575 }
 0x7b6   :  { %v1594_v35 = vsub.f32 %v2416_v63, %v1576_v52  ;;  %v1602_v51 = vmul.f32 1.442695, %v1593_v55 }
 0x7b8   :  { %v1604_v22 = vmul.f32 1.442695, %v1594_v35 }
 0x7b9   :  { %v1582_v44 = vpop.xlane.xlu1 %1581  ;;  %v1579_v49 = vpop.xlane.xlu0 %1578 }
 0x7ba   :  { %2629 = vpow2.f32 %v1604_v22  ;;  %v1595_v12 = vsub.f32 %v2417_v61, %v1579_v49  ;;  %v1596_v4 = vsub.f32 %v1553_v25, %v1582_v44 }
 0x7bb   :  { %2631 = vpow2.f32 %v1600_v13 }
 0x7bc   :  { %v1606_v2 = vmul.f32 1.442695, %v1595_v12  ;;  %v1608_v42 = vmul.f32 1.442695, %v1596_v4 }
 0x7bd   :  { %v1588_v26 = vpop.xlane.xlu1 %1587  ;;  %v1585_v53 = vpop.xlane.xlu0 %1584 }
 0x7be   :  { %v1598_v5 = vsub.f32 %v2420_v16, %v1588_v26  ;;  %2633 = vpow2.f32 %v1606_v2  ;;  %v1597_v60 = vsub.f32 %v1556_v23, %v1585_v53 }
 0x7bf   :  { %2635 = vpow2.f32 %v1602_v51 }
 0x7c0   :  { %v1612_v50 = vmul.f32 1.442695, %v1598_v5  ;;  %v1610_v44 = vmul.f32 1.442695, %v1597_v60 }
 0x7c1   :  { %v1665_v63 = vpop.permute.xlu1 %1664  ;;  %v1591_v11 = vpop.xlane.xlu0 %1590 }
 0x7c2   :  { %2637 = vpow2.f32 %v1612_v50  ;;  %v1599_v37 = vsub.f32 %v2421_v62, %v1591_v11  ;;  %2422 = vmatprep.subr.bf16.mxu1 %v1665_v63 }
 0x7c3   :  { %2423 = vmatpush3.bf16.msra.mxu1 %v1665_v63  ;;  %2639 = vpow2.f32 %v1608_v42  ;;  %v3617_v63 = vld [vmem:[%s3974_s4] ss:$0 sm:$0xff] }
 0x7c4   :  { %v3563_v29 = vpop.eup %2629  ;;  %v1614_v49 = vmul.f32 1.442695, %v1599_v37  ;;  %v1166_v37 = vadd.f32 %v3617_v63, %v2975_v20 }
 0x7c5   :  { %v1622_v12 = vsel %vm447_vm3, %v3563_v29, 0.0  ;;  %v2632_v61 = vpop.eup %2631 }
 0x7c6   :  { %2641 = vpow2.f32 %v1614_v49  ;;  %1623 = vadd.xlane.f32.xlu1 %v1622_v12  ;;  %v1616_v53 = vsel %vm447_vm3, %v2632_v61, 0.0  ;;  %v3624_v12 = vmul.f32 0.0, %v2930_v47 }
 0x7c7   :  { %2643 = vpow2.f32 %v1610_v44 }
 0x7c8   :  { %v3567_v5 = vpop.eup %2633 }
 0x7c9   :  { %v1625_v51 = vsel %vm447_vm3, %v3567_v5, 0.0  ;;  %v2636_v16 = vpop.eup %2635 }
 0x7ca   :  { %1617 = vadd.xlane.f32.xlu1 %v1616_v53  ;;  %1626 = vadd.xlane.f32.xlu0 %v1625_v51  ;;  %v1619_v52 = vsel %vm447_vm3, %v2636_v16, 0.0  ;;  %v1165_v51 = vadd.f32 %v3617_v63, %v2986_v40  ;;  %v2525_v40 = vld [vmem:[%s3975_s5] sm:$0xff]  }
 0x7cc   :  { %v3572_v25 = vpop.eup %2637 }
 0x7cd   :  { %v1634_v62 = vsel %vm447_vm3, %v3572_v25, 0.0  ;;  %v3576_v23 = vpop.eup %2639 }
 0x7ce   :  { %1635 = vadd.xlane.f32.xlu1 %v1634_v62  ;;  %1620 = vadd.xlane.f32.xlu0 %v1619_v52  ;;  %v1628_v13 = vsel %vm447_vm3, %v3576_v23, 0.0 }
 0x7d0   :  { %v3579_v35 = vpop.eup %2641 }
 0x7d1   :  { %v1637_v22 = vsel %vm447_vm3, %v3579_v35, 0.0  ;;  %v3585_v55 = vpop.eup %2643 }
 0x7d2   :  { %1629 = vadd.xlane.f32.xlu1 %v1628_v13  ;;  %1638 = vadd.xlane.f32.xlu0 %v1637_v22  ;;  %v1631_v4 = vsel %vm447_vm3, %v3585_v55, 0.0 }
 0x7d6   :  { %1632 = vadd.xlane.f32.xlu0 %v1631_v4 }
 0x7e3   :  { %1668 = vrot.lane.b32.xlu1 %v3477_v17, %s2687_s0 }
 0x7e7   :  { %1670 = vrot.lane.b32.xlu1 %v3494_v24, %s2687_s0 }
 0x7eb   :  { %917 = vrot.lane.b32.xlu1 %v3527_v19, %s2687_s0 }
 0x7ec   :  { %1666 = vrot.lane.b32.xlu0 %v3460_v30, %s2687_s0 }
 0x7ef   :  { %921 = vrot.lane.b32.xlu1 %v3525_v21, %s2687_s0 }
 0x7f0   :  { %915 = vrot.lane.b32.xlu0 %v3523_v57, %s2687_s0 }
 0x7f3   :  { %925 = vrot.lane.b32.xlu1 %v3535_v9, %s2687_s0 }
 0x7f4   :  { %919 = vrot.lane.b32.xlu0 %v3521_v3, %s2687_s0 }
 0x7f7   :  { %929 = vrot.lane.b32.xlu1 %v3533_v6, %s2687_s0 }
 0x7f8   :  { %923 = vrot.lane.b32.xlu0 %v3531_v14, %s2687_s0 }
 0x7fc   :  { %927 = vrot.lane.b32.xlu0 %v3529_v48, %s2687_s0  ;;  %v3612_v48 = vmul.f32 0.0, %v2921_v39 }
 0x7fe   :  { %v1118_v44 = vadd.f32 %v3612_v48, %v3129_v18 }
 0x853   :  { %v1624_v30 = vpop.xlane.xlu1 %1623 }
 0x857   :  { %v1618_v17 = vpop.xlane.xlu1 %1617  ;;  %v1627_v24 = vpop.xlane.xlu0 %1626 }
 0x858   :  { %2645 = vrcp.f32 %v1618_v17  ;;  %v1138_v17 = vadd.f32 %v3624_v12, %v1118_v44 }
 0x85b   :  { %v1636_v57 = vpop.xlane.xlu1 %1635  ;;  %v1621_v21 = vpop.xlane.xlu0 %1620 }
 0x85c   :  { %2647 = vrcp.f32 %v1621_v21 }
 0x85d   :  { %2649 = vrcp.f32 %v1627_v24 }
 0x85e   :  { %2651 = vrcp.f32 %v1624_v30 }
 0x85f   :  { %v1630_v19 = vpop.xlane.xlu1 %1629  ;;  %v1639_v9 = vpop.xlane.xlu0 %1638 }
 0x860   :  { %2653 = vrcp.f32 %v1630_v19 }
 0x862   :  { %v2646_v2 = vpop.eup %2645 }
 0x863   :  { %v1669_v3 = vpop.permute.xlu1 %1668  ;;  %v1633_v6 = vpop.xlane.xlu0 %1632  ;;  %v1648_v50 = vmul.f32 %v2646_v2, %v2632_v61 }
 0x864   :  { %2655 = vrcp.f32 %v1633_v6 }
 0x865   :  { %2657 = vrcp.f32 %v1639_v9 }
 0x866   :  { %v2648_v14 = vpop.eup %2647  ;;  %2659 = vrcp.f32 %v1636_v57 }
 0x867   :  { %v1671_v26 = vpop.permute.xlu1 %1670  ;;  %v1667_v42 = vpop.permute.xlu0 %1666  ;;  %v1649_v60 = vmul.f32 %v2648_v14, %v2636_v16 }
 0x868   :  { %2424 = vmatprep.subr.bf16.mxu1 %v1667_v42  ;;  %v2650_v61 = vpop.eup %2649 }
 0x869   :  { %2425 = vmatpush3.bf16.msra.mxu1 %v1667_v42  ;;  %v1656_v11 = vpack.c.bf16 %v1649_v60, %v1648_v50  ;;  %v2652_v62 = vpop.eup %2651  ;;  %v1651_v4 = vmul.f32 %v2650_v61, %v3567_v5 }
 0x86a   :  { %2426 = vmatprep.subr.bf16.mxu1 %v1669_v3  ;;  %v2654_v52 = vpop.eup %2653  ;;  %v1650_v9 = vmul.f32 %v2652_v62, %v3563_v29  ;;  %v2526_v29 = vld [vmem:[%s3975_s5 + $0x8] sm:$0xff]  }
 0x86b   :  { %v918_v49 = vpop.permute.xlu1 %917  ;;  %2430 = vmatprep.mubr.msk.bf16.mxu1 %vm447_vm3, %v1656_v11  ;;  %v916_v16 = vpop.permute.xlu0 %915  ;;  %v1652_v14 = vmul.f32 %v2654_v52, %v3576_v23  ;;  %v1169_v23 = vadd.f32 %v3617_v63, %v3140_v45  ;;  %v2527_v45 = vld [vmem:[%s3975_s5 + $0x10] sm:$0xff]  }
 0x86c   :  { %v940_v53 = vsel %vm447_vm3, %v3273_v1, %v918_v49  ;;  %v939_v18 = vsel %vm447_vm3, %v3269_v36, %v916_v16  ;;  %v1168_v1 = vadd.f32 %v3617_v63, %v3060_v59  ;;  %v3645_v36 = vld [vmem:[%s3973_s3 + $0x8] ss:$0 sm:$0xff]  ;;  %v1167_v59 = vadd.f32 %v3617_v63, %v3100_v0 }
 0x86d   :  { %v3631_v20 = vadd.f32 %v1166_v37, %v940_v53  ;;  %v1173_v13 = vadd.f32 %v1165_v51, %v939_v18  ;;  %2427 = vmatpush3.bf16.msra.mxu1 %v1669_v3  ;;  %v3648_v24 = vmul.f32 0.0, %v3645_v36  ;;  %v1657_v42 = vpack.c.bf16 %v1651_v4, %v1650_v9  ;;  %v4008_v18 = vld [vmem:[#allocation13_spill] sm:$0xff]  ;;  %v2528_v4 = vld [vmem:[%s3975_s5 + $0x18] sm:$0xff]  }
 0x86e   :  { %v2656_v22 = vpop.eup %2655  ;;  %2428 = vmatprep.subr.bf16.mxu1 %v1671_v26  ;;  %v1171_v51 = vadd.f32 %v3617_v63, %v3145_v8  ;;  %v2529_v8 = vld [vmem:[%s3975_s5 + $0x20] sm:$0xff]  }
 0x86f   :  { %v922_v30 = vpop.permute.xlu1 %921  ;;  %v920_v57 = vpop.permute.xlu0 %919  ;;  %v1653_v21 = vmul.f32 %v2656_v22, %v3585_v55  ;;  %v1181_v19 = vpack.c.bf16 %v3631_v20, %v1173_v13  ;;  %v1158_v55 = vadd.f32 %v3648_v24, %v1138_v17 }
 0x870   :  { %v942_v5 = vsel %vm447_vm3, %v3271_v43, %v922_v30  ;;  %v941_v6 = vsel %vm447_vm3, %v3267_v15, %v920_v57  ;;  %v1170_v43 = vadd.f32 %v3617_v63, %v3133_v54  ;;  %v2658_v50 = vpop.eup %2657  ;;  %v2532_v30 = vld [vmem:[%s3975_s5 + $0x38] sm:$0xff]  }
 0x871   :  { %v1176_v3 = vadd.f32 %v1168_v1, %v942_v5  ;;  %v1175_v2 = vadd.f32 %v1167_v59, %v941_v6  ;;  %2429 = vmatpush3.bf16.msra.mxu1 %v1671_v26  ;;  %v1658_v11 = vpack.c.bf16 %v1653_v21, %v1652_v14  ;;  %v2660_v49 = vpop.eup %2659  ;;  %v1172_v61 = vadd.f32 %v3617_v63, %v1158_v55  ;;  %v2531_v1 = vld [vmem:[%s3975_s5 + $0x30] sm:$0xff]  }
 0x872   :  { %2438 = vmatprep.subr.bf16.mxu1 %v2525_v40  ;;  %v1654_v13 = vmul.f32 %v2660_v49, %v3572_v25  ;;  %v2530_v25 = vld [vmem:[%s3975_s5 + $0x28] sm:$0xff]   ;;  %v1793_v49 = vrot.slane %v3434_v58, 7 }
 0x873   :  { %v926_v0 = vpop.permute.xlu1 %925  ;;  %v1182_v60 = vpack.c.bf16 %v1176_v3, %v1175_v2  ;;  %v924_v26 = vpop.permute.xlu0 %923  ;;  %v3713_v3 = vld [vmem:[%s3976_s6] ss:$0 sm:$0xff]  ;;  %s2690_s6 = smov [#allocation2]  }
 0x874   :  { %v944_v15 = vsel %vm447_vm3, %v3281_v32, %v926_v0  ;;  %v943_v54 = vsel %vm447_vm3, %v3277_v46, %v924_v26  ;;  %2431 = vmatmul.mubr.msk.bf16.vlgmr.msra.gmra.mrb[24].mxu1 %vm447_vm3, %v1657_v42  ;;  %v1655_v32 = vmul.f32 %v2658_v50, %v3579_v35  ;;  %s2152_s27 = sshll.u32 %s2690_s6, 4  ;;  %s2153_s27 = int_to_ptr.vmem [resolvable:$true] %s2152_s27 }
 0x875   :  { %v1178_v37 = vadd.f32 %v1170_v43, %v944_v15  ;;  %v1177_v44 = vadd.f32 %v1169_v23, %v943_v54  ;;  %2434 = vmatprep.mubr.msk.bf16.mxu1 %vm447_vm3, %v1658_v11  ;;  %2439 = vmatpush3.bf16.msra.mxu1 %v2525_v40  ;;  %s2662_s28 = scalar_lea.vmem %s2153_s27, 2048  ;;  %p2667_p1 = scmp.lt.s32.totalorder %s2153_s27, %s2153_s27 }
 0x876   :  { %2440 = vmatprep.subr.bf16.mxu1 %v2526_v29  ;;  %v1659_v35 = vpack.c.bf16 %v1655_v32, %v1654_v13  ;;  %p2663_p0 = scmp.ne.s32.totalorder %s2153_s27, %s2662_s28  ;;  %p2668_p2 = scmp.lt.s32.totalorder %s2662_s28, %s2662_s28 }
 0x877   :  { %v930_v53 = vpop.permute.xlu1 %929  ;;  %v928_v16 = vpop.permute.xlu0 %927  ;;  %v1183_v62 = vpack.c.bf16 %v1178_v37, %v1177_v44  ;;  %v1809_v44 = vrot.slane %v3434_v58, 1 }
 0x878   :  { %v946_v46 = vsel %vm447_vm3, %v3279_v27, %v930_v53  ;;  %v945_v52 = vsel %vm447_vm3, %v4008_v18, %v928_v16  ;;  %v1801_v53 = vsel %vm335_vm0, %v1793_v49, 0.0  ;;  %p2669_p3 = por %p2668_p2, %p2667_p1 }
 0x879   :  { %v1180_v20 = vadd.f32 %v1172_v61, %v946_v46  ;;  %v1179_v22 = vadd.f32 %v1171_v51, %v945_v52  ;;  %2441 = vmatpush3.bf16.msra.mxu1 %v2526_v29  ;;  %v1817_v32 = vsel %vm336_vm1, %v1809_v44, 0.0  ;;  %v4011_v51 = vld [vmem:[#allocation7_spill] sm:$0xff] }
 0x87a   :  { %2442 = vmatprep.subr.bf16.mxu1 %v2527_v45  ;;  %v1839_v16 = vmul.f32 %v4011_v51, %v3434_v58  ;;  %p2670_p4 = pnand %p2669_p3, %p2663_p0 }
 0x87b   :  { %v1184_v27 = vpack.c.bf16 %v1180_v20, %v1179_v22  ;;  %v4012_v20 = vld [vmem:[#allocation8_spill] sm:$0xff]  ;;  %v1810_v22 = vrot.slane %v3438_v28, 1 }
 0x87c   :  { %2435 = vmatmul.mubr.msk.bf16.gmra.mrb[28].mxu1 %vm447_vm3, %v1659_v35  ;;  %v1853_v18 = vmul.f32 %v1817_v32, %v4012_v20  ;;  %v1795_v35 = vrot.slane %v3450_v33, 7 }
 0x87d   :  { %2443 = vmatpush3.bf16.msra.mxu1 %v2527_v45  ;;  %2454 = vmatprep.mubr.bf16.mxu1 %v1181_v19  ;;  %v4010_v45 = vld [vmem:[#allocation6_spill] sm:$0xff] }
 0x87e   :  { %2444 = vmatprep.subr.bf16.mxu1 %v2528_v4  ;;  %v1825_v46 = vmul.f32 %v1801_v53, %v4010_v45 }
 0x880   :  { %v1846_v52 = vadd.f32 %v1839_v16, %v1825_v46 }
 0x881   :  { %2445 = vmatpush3.bf16.msra.mxu1 %v2528_v4  ;;  %v4013_v4 = vld [vmem:[#allocation9_spill] sm:$0xff] }
 0x882   :  { %2446 = vmatprep.subr.bf16.mxu1 %v2529_v8 }
 0x885   :  { %2447 = vmatpush3.bf16.msra.mxu1 %v2529_v8  ;;  %v1811_v8 = vrot.slane %v3450_v33, 1 }
 0x886   :  { %2448 = vmatprep.subr.bf16.mxu1 %v2530_v25 }
 0x889   :  { %2449 = vmatpush3.bf16.msra.mxu1 %v2530_v25  ;;  %v1796_v25 = vrot.slane %v3454_v31, 7 }
 0x88a   :  { %2450 = vmatprep.subr.bf16.mxu1 %v2531_v1 }
 0x88d   :  { %2451 = vmatpush3.bf16.msra.mxu1 %v2531_v1  ;;  %v4014_v1 = vld [vmem:[#allocation11_spill] sm:$0xff] }
 0x88e   :  { %2452 = vmatprep.subr.bf16.mxu1 %v2532_v30 }
 0x891   :  { %2453 = vmatpush3.bf16.msra.mxu1 %v2532_v30  ;;  %v1883_v30 = vmul.f32 %v4014_v1, %v3434_v58  ;;  %v3759_v58 = vsel %vm335_vm0, %v1795_v35, 0.0  ;;  %v1814_v35 = vrot.slane %v3470_v7, 1 }
 0x894   :  { %2455 = vmatmul.mubr.bf16.vlgmr.msra.gmra.mrb[32].mxu1 %v1182_v60 }
 0x895   :  { %2458 = vmatprep.mubr.bf16.mxu1 %v1183_v62  ;;  %v1794_v62 = vrot.slane %v3438_v28, 7 }
 0x897   :  { %v3736_v13 = vsel %vm335_vm0, %v1794_v62, 0.0  ;;  %v1799_v62 = vrot.slane %v3484_v38, 7 }
 0x89c   :  { %2459 = vmatmul.mubr.bf16.gmra.mrb[36].mxu1 %v1184_v27  ;;  %v1867_v27 = vmul.f32 %v1801_v53, %v4013_v4 }
 0x947   :  { %v2432_v40 = vpop.f32.mrb[24].mxu1 }
 0x948   :  { %v1722_v17 = vpop.f32.mrb[25].mxu1 }
 0x949   :  { %1761 = vrot.lane.b32.xlu0 %v1722_v17, %s2687_s0  ;;  %v2433_v5 = vpop.f32.mrb[26].mxu1  ;;  %v1841_v17 = vmul.f32 %v4011_v51, %v3450_v33 }
 0x94a   :  { %v1725_v59 = vpop.f32.mrb[27].mxu1 }
 0x94b   :  { %1763 = vrot.lane.b32.xlu1 %v1725_v59, %s2687_s0  ;;  %v1860_v59 = vadd.f32 %v1853_v18, %v1846_v52 }
 0x94d   :  { %1765 = vrot.lane.b32.xlu0 %v2432_v40, %s2687_s0  ;;  %v1840_v40 = vmul.f32 %v4011_v51, %v3438_v28 }
 0x94f   :  { %1767 = vrot.lane.b32.xlu1 %v2433_v5, %s2687_s0  ;;  %v2436_v57 = vpop.f32.mrb[28].mxu1  ;;  %v1826_v5 = vmul.f32 %v3736_v13, %v4010_v45 }
 0x950   :  { %v1738_v21 = vpop.f32.mrb[29].mxu1 }
 0x951   :  { %1769 = vrot.lane.b32.xlu0 %v1738_v21, %s2687_s0  ;;  %v2437_v19 = vpop.f32.mrb[30].mxu1  ;;  %v3755_v21 = vsel %vm336_vm1, %v1810_v22, 0.0 }
 0x952   :  { %v1741_v9 = vpop.f32.mrb[31].mxu1 }
 0x953   :  { %1771 = vrot.lane.b32.xlu1 %v1741_v9, %s2687_s0  ;;  %v1844_v9 = vmul.f32 %v4011_v51, %v3470_v7 }
 0x955   :  { %1773 = vrot.lane.b32.xlu0 %v2436_v57, %s2687_s0  ;;  %v1842_v57 = vmul.f32 %v4011_v51, %v3454_v31 }
 0x957   :  { %1775 = vrot.lane.b32.xlu1 %v2437_v19, %s2687_s0  ;;  %v1843_v19 = vmul.f32 %v4011_v51, %v3466_v56 }
 0x967   :  { %v2456_v6 = vpop.f32.mrb[32].mxu1 }
 0x968   :  { %v2077_v2 = vadd.f32 %v2456_v6, %v3713_v3  ;;  %v2068_v14 = vpop.f32.mrb[33].mxu1  ;;  %v1827_v6 = vmul.f32 %v3759_v58, %v4010_v45 }
 0x969   :  { %v2069_v42 = vadd.f32 %v3713_v3, %v2068_v14  ;;  %v2457_v43 = vpop.f32.mrb[34].mxu1  ;;  %v4015_v14 = vld [vmem:[#allocation10_spill] sm:$0xff] }
 0x96a   :  { %2133 = vst [vmem:[#allocation2 + $0x10] sm:$0xff] %v2077_v2  ;;  %v2080_v0 = vadd.f32 %v2457_v43, %v3713_v3  ;;  %v2071_v55 = vpop.f32.mrb[35].mxu1  ;;  %v1797_v2 = vrot.slane %v3466_v56, 7  ;;  %v3771_v43 = vsel %vm336_vm1, %v1811_v8, 0.0 }
 0x96b   :  { %2131 = vst [vmem:[#allocation2] sm:$0xff] %v2069_v42  ;;  %v2072_v29 = vadd.f32 %v3713_v3, %v2071_v55  ;;  %v1875_v42 = vadd.f32 %v1867_v27, %v4015_v14  ;;  %v1812_v55 = vrot.slane %v3454_v31, 1  ;;  %v1855_v49 = vmul.f32 %v3771_v43, %v4012_v20 }
 0x96c   :  { %2134 = vst [vmem:[#allocation2 + $0x18] sm:$0xff] %v2080_v0  ;;  %v3775_v0 = vsel %vm335_vm0, %v1796_v25, 0.0  ;;  %v3797_v53 = vsel %vm335_vm0, %v1797_v2, 0.0  ;;  %v1869_v27 = vmul.f32 %v3759_v58, %v4013_v4  ;;  %v1884_v25 = vmul.f32 %v4014_v1, %v3438_v28 }
 0x96d   :  { %2132 = vst [vmem:[#allocation2 + $0x8] sm:$0xff] %v2072_v29  ;;  %v1847_v29 = vadd.f32 %v1840_v40, %v1826_v5  ;;  %v1828_v44 = vmul.f32 %v3775_v0, %v4010_v45  ;;  %v1891_v46 = vadd.f32 %v1883_v30, %v1875_v42  ;;  %v1829_v16 = vmul.f32 %v3797_v53, %v4010_v45 }
 0x96e   :  { %v1815_v30 = vrot.slane %v3484_v38, 1  ;;  %v3830_v42 = vsel %vm335_vm0, %v1799_v62, 0.0 }
 0x96f   :  { %v2460_v50 = vpop.f32.mrb[36].mxu1  ;;  %v1850_v2 = vadd.f32 %v1843_v19, %v1829_v16  ;;  %v1831_v19 = vmul.f32 %v3830_v42, %v4010_v45  ;;  %v1886_v16 = vmul.f32 %v4014_v1, %v3454_v31 }
 0x970   :  { %v2093_v60 = vadd.f32 %v2460_v50, %v3713_v3  ;;  %v2084_v15 = vpop.f32.mrb[37].mxu1  ;;  %v1854_v50 = vmul.f32 %v3755_v21, %v4012_v20 }
 0x971   :  { %v2085_v23 = vadd.f32 %v3713_v3, %v2084_v15  ;;  %v2461_v26 = vpop.f32.mrb[38].mxu1  ;;  %v1798_v15 = vrot.slane %v3470_v7, 7 }
 0x972   :  { %2137 = vst [vmem:[#allocation2 + $0x30] sm:$0xff] %v2093_v60  ;;  %v2096_v11 = vadd.f32 %v2461_v26, %v3713_v3  ;;  %v2087_v37 = vpop.f32.mrb[39].mxu1  ;;  %v1813_v60 = vrot.slane %v3466_v56, 1  ;;  %v1800_v26 = vrot.slane %v3488_v41, 7  ;;  %v1861_v18 = vadd.f32 %v1854_v50, %v1847_v29 }
 0x973   :  { %2135 = vst [vmem:[#allocation2 + $0x20] sm:$0xff] %v2085_v23  ;;  %v2088_v54 = vadd.f32 %v3713_v3, %v2087_v37  ;;  %v1845_v23 = vmul.f32 %v4011_v51, %v3484_v38  ;;  %v1868_v37 = vmul.f32 %v3736_v13, %v4013_v4  ;;  %v3801_v51 = vsel %vm336_vm1, %v1812_v55, 0.0  ;;  %v4016_v55 = vld [vmem:[#allocation12_spill] sm:$0xff] }
 0x974   :  { %2138 = vst [vmem:[#allocation2 + $0x38] sm:$0xff] %v2096_v11  ;;  %v3787_v11 = vmul.f32 %v4014_v1, %v3488_v41  ;;  %v3808_v52 = vsel %vm336_vm1, %v1813_v60, 0.0  ;;  %v3812_v22 = vsel %vm335_vm0, %v1798_v15, 0.0  ;;  %v1856_v5 = vmul.f32 %v3801_v51, %v4012_v20 }
 0x975   :  { %2136 = vst [vmem:[#allocation2 + $0x28] sm:$0xff] %v2088_v54  ;;  %v1848_v54 = vadd.f32 %v1841_v17, %v1827_v6  ;;  %v1876_v8 = vadd.f32 %v1868_v37, %v1860_v59  ;;  %v1849_v17 = vadd.f32 %v1842_v57, %v1828_v44  ;;  %v1870_v6 = vmul.f32 %v3775_v0, %v4013_v4 }
 0x976   :  { %v1857_v14 = vmul.f32 %v3808_v52, %v4012_v20  ;;  %v1830_v59 = vmul.f32 %v3812_v22, %v4010_v45  ;;  %v1899_v29 = vmul.f32 %v1817_v32, %v4016_v55  ;;  %v1900_v57 = vmul.f32 %v3755_v21, %v4016_v55 }
 0x977   :  { %v1862_v40 = vadd.f32 %v1855_v49, %v1848_v54  ;;  %v3837_v50 = vsel %vm336_vm1, %v1814_v35, 0.0  ;;  %v1892_v60 = vadd.f32 %v1884_v25, %v1876_v8  ;;  %v1877_v15 = vadd.f32 %v1869_v27, %v1861_v18 }
 0x978   :  { %v1885_v37 = vmul.f32 %v4014_v1, %v3450_v33  ;;  %v3845_v54 = vsel %vm336_vm1, %v1815_v30, 0.0  ;;  %v1863_v32 = vadd.f32 %v1856_v5, %v1849_v17  ;;  %v1871_v49 = vmul.f32 %v3797_v53, %v4013_v4 }
 0x979   :  { %v1878_v44 = vadd.f32 %v1870_v6, %v1862_v40  ;;  %v1864_v62 = vadd.f32 %v1857_v14, %v1850_v2  ;;  %v1851_v35 = vadd.f32 %v1844_v9, %v1830_v59  ;;  %v1858_v45 = vmul.f32 %v3837_v50, %v4012_v20 }
 0x97a   :  { %v1872_v18 = vmul.f32 %v3812_v22, %v4013_v4  ;;  %v1907_v27 = vadd.f32 %v1899_v29, %v1891_v46  ;;  %v1915_v8 = vmul.f32 %v3736_v13, %v2921_v39  ;;  %v1852_v25 = vadd.f32 %v1845_v23, %v1831_v19 }
 0x97b   :  { %v1859_v30 = vmul.f32 %v3845_v54, %v4012_v20  ;;  %v1930_v40 = vmul.f32 %v2930_v47, %v3438_v28  ;;  %v1908_v17 = vadd.f32 %v1900_v57, %v1892_v60  ;;  %v1916_v9 = vmul.f32 %v3759_v58, %v2921_v39 }
 0x97c   :  { %v1808_v5 = vsel %vm335_vm0, %v1800_v26, 0.0  ;;  %v1901_v46 = vmul.f32 %v3771_v43, %v4016_v55  ;;  %v1893_v6 = vadd.f32 %v1885_v37, %v1877_v15  ;;  %v1902_v13 = vmul.f32 %v3801_v51, %v4016_v55 }
 0x97d   :  { %v1894_v23 = vadd.f32 %v1886_v16, %v1878_v44  ;;  %v1865_v2 = vadd.f32 %v1858_v45, %v1851_v35  ;;  %v1879_v20 = vadd.f32 %v1871_v49, %v1863_v32  ;;  %v1887_v28 = vmul.f32 %v4014_v1, %v3466_v56 }
 0x97e   :  { %v1880_v14 = vadd.f32 %v1872_v18, %v1864_v62  ;;  %v1866_v59 = vadd.f32 %v1859_v30, %v1852_v25  ;;  %v1873_v58 = vmul.f32 %v3830_v42, %v4013_v4  ;;  %v1888_v26 = vmul.f32 %v4014_v1, %v3470_v7 }
 0x97f   :  { %v1874_v29 = vmul.f32 %v1808_v5, %v4013_v4  ;;  %v1922_v57 = vadd.f32 %v1915_v8, %v1907_v27  ;;  %v1923_v19 = vadd.f32 %v1916_v9, %v1908_v17  ;;  %v1931_v60 = vmul.f32 %v2930_v47, %v3450_v33 }
 0x980   :  { %v1816_v15 = vrot.slane %v3488_v41, 1  ;;  %v1909_v37 = vadd.f32 %v1901_v46, %v1893_v6  ;;  %v1917_v32 = vmul.f32 %v3775_v0, %v2921_v39  ;;  %v1910_v49 = vadd.f32 %v1902_v13, %v1894_v23 }
 0x981   :  { %v1918_v44 = vmul.f32 %v3797_v53, %v2921_v39  ;;  %v1945_v16 = vmul.f32 %v3645_v36, %v3755_v21  ;;  %v1903_v4 = vmul.f32 %v3808_v52, %v4016_v55  ;;  %v1895_v62 = vadd.f32 %v1887_v28, %v1879_v20 }
 0x982   :  { %v1904_v33 = vmul.f32 %v3837_v50, %v4016_v55  ;;  %v1896_v35 = vadd.f32 %v1888_v26, %v1880_v14  ;;  %v1881_v45 = vadd.f32 %v1873_v58, %v1865_v2  ;;  %v1889_v18 = vmul.f32 %v4014_v1, %v3484_v38 }
 0x983   :  { %v1882_v0 = vadd.f32 %v1874_v29, %v1866_v59  ;;  %v1937_v27 = vadd.f32 %v1930_v40, %v1922_v57  ;;  %v1938_v8 = vadd.f32 %v1931_v60, %v1923_v19  ;;  %v1946_v53 = vmul.f32 %v3645_v36, %v3771_v43 }
 0x984   :  { %v1824_v21 = vsel %vm336_vm1, %v1816_v15, 0.0  ;;  %v1924_v25 = vadd.f32 %v1917_v32, %v1909_v37  ;;  %v1932_v30 = vmul.f32 %v2930_v47, %v3454_v31  ;;  %v1925_v17 = vadd.f32 %v1918_v44, %v1910_v49 }
 0x985   :  { %v1933_v9 = vmul.f32 %v2930_v47, %v3466_v56  ;;  %v1911_v46 = vadd.f32 %v1903_v4, %v1895_v62  ;;  %v1919_v1 = vmul.f32 %v3812_v22, %v2921_v39  ;;  %v1905_v40 = vmul.f32 %v3845_v54, %v4016_v55  ;;  %v4017_v62 = vld [vmem:[#allocation14_spill] sm:$0xff] }
 0x986   :  { %v1920_v43 = vmul.f32 %v3830_v42, %v2921_v39  ;;  %v1912_v61 = vadd.f32 %v1904_v33, %v1896_v35  ;;  %v1897_v6 = vadd.f32 %v1889_v18, %v1881_v45  ;;  %v1906_v13 = vmul.f32 %v1824_v21, %v4016_v55 }
 0x987   :  { %v1898_v31 = vadd.f32 %v3787_v11, %v1882_v0  ;;  %v1952_v23 = vadd.f32 %v1945_v16, %v1937_v27  ;;  %v1953_v2 = vadd.f32 %v1946_v53, %v1938_v8  ;;  %v1939_v20 = vadd.f32 %v1932_v30, %v1924_v25 }
 0x988   :  { %v1947_v56 = vmul.f32 %v3645_v36, %v3801_v51  ;;  %v1948_v22 = vmul.f32 %v3645_v36, %v3808_v52  ;;  %v1940_v28 = vadd.f32 %v1933_v9, %v1925_v17  ;;  %v1926_v14 = vadd.f32 %v1919_v1, %v1911_v46  ;;  %v4019_v17 = vld [vmem:[#allocation17_spill] sm:$0xff] }
 0x989   :  { %v1934_v42 = vmul.f32 %v2930_v47, %v3470_v7  ;;  %v1935_v59 = vmul.f32 %v2930_v47, %v3484_v38  ;;  %v1927_v55 = vadd.f32 %v1920_v43, %v1912_v61  ;;  %v1913_v58 = vadd.f32 %v1905_v40, %v1897_v6 }
 0x98a   :  { %v1921_v11 = vmul.f32 %v1808_v5, %v2921_v39  ;;  %v1914_v26 = vadd.f32 %v1906_v13, %v1898_v31  ;;  %v1960_v29 = vadd.f32 %v3617_v63, %v1952_v23  ;;  %v1961_v51 = vadd.f32 %v3617_v63, %v1953_v2  ;;  %v4021_v31 = vld [vmem:[#allocation16_spill] sm:$0xff] }
 0x98b   :  { %v1954_v19 = vadd.f32 %v1947_v56, %v1939_v20  ;;  %v1949_v52 = vmul.f32 %v3645_v36, %v3837_v50  ;;  %v1955_v60 = vadd.f32 %v1948_v22, %v1940_v28  ;;  %v1941_v15 = vadd.f32 %v1934_v42, %v1926_v14  ;;  %v4022_v28 = vld [vmem:[#allocation18_spill] sm:$0xff] }
 0x98c   :  { %v1950_v38 = vmul.f32 %v3645_v36, %v3845_v54  ;;  %v1942_v39 = vadd.f32 %v1935_v59, %v1927_v55  ;;  %v1928_v5 = vadd.f32 %v1921_v11, %v1913_v58  ;;  %v1936_v32 = vmul.f32 %v2930_v47, %v3488_v41 }
 0x98d   :  { %v1929_v49 = vadd.f32 %v1914_v26, %v3612_v48  ;;  %v1963_v54 = vadd.f32 %v3617_v63, %v1955_v60  ;;  %v1956_v35 = vadd.f32 %v1949_v52, %v1941_v15  ;;  %v1951_v45 = vmul.f32 %v3645_v36, %v1824_v21 }
 0x98e   :  { %v1957_v41 = vadd.f32 %v1950_v38, %v1942_v39  ;;  %v1943_v48 = vadd.f32 %v1936_v32, %v1928_v5 }
 0x98f   :  { %v1944_v0 = vadd.f32 %v1929_v49, %v3624_v12  ;;  %v1964_v30 = vadd.f32 %v3617_v63, %v1956_v35  ;;  %v4020_v12 = vld [vmem:[#allocation19_spill] sm:$0xff] }
 0x990   :  { %v1965_v36 = vadd.f32 %v3617_v63, %v1957_v41  ;;  %v1958_v1 = vadd.f32 %v1951_v45, %v1943_v48 }
 0x991   :  { %v1959_v40 = vadd.f32 %v1944_v0, %v3648_v24 }
 0x992   :  { %v1966_v2 = vadd.f32 %v3617_v63, %v1958_v1 }
 0x993   :  { %v1967_v20 = vadd.f32 %v3617_v63, %v1959_v40 }
 0x9bb   :  { %v1762_v57 = vpop.permute.xlu0 %1761 }
 0x9bc   :  { %v1785_v7 = vsel %vm447_vm3, %v3539_v10, %v1762_v57  ;;  %v1962_v10 = vadd.f32 %v3617_v63, %v1954_v19 }
 0x9bd   :  { %v1764_v37 = vpop.permute.xlu1 %1763  ;;  %v1968_v50 = vadd.f32 %v1960_v29, %v1785_v7 }
 0x9be   :  { %v1786_v44 = vsel %vm447_vm3, %v3543_v34, %v1764_v37  ;;  %v4018_v34 = vld [vmem:[#allocation15_spill] sm:$0xff] }
 0x9bf   :  { %v1969_v16 = vadd.f32 %v1961_v51, %v1786_v44  ;;  %v1766_v4 = vpop.permute.xlu0 %1765 }
 0x9c0   :  { %v1787_v33 = vsel %vm447_vm3, %v4017_v62, %v1766_v4 }
 0x9c1   :  { %v1768_v18 = vpop.permute.xlu1 %1767  ;;  %v1976_v47 = vpack.c.bf16 %v1969_v16, %v1968_v50  ;;  %v1970_v8 = vadd.f32 %v1962_v10, %v1787_v33 }
 0x9c2   :  { %v1788_v27 = vsel %vm447_vm3, %v4018_v34, %v1768_v18 }
 0x9c3   :  { %v1971_v53 = vadd.f32 %v1963_v54, %v1788_v27  ;;  %2462 = vmatprep.mubr.bf16.mxu1 %v1976_v47  ;;  %v1770_v25 = vpop.permute.xlu0 %1769 }
 0x9c4   :  { %v1789_v9 = vsel %vm447_vm3, %v4019_v17, %v1770_v25 }
 0x9c5   :  { %v1772_v21 = vpop.permute.xlu1 %1771  ;;  %v1977_v46 = vpack.c.bf16 %v1971_v53, %v1970_v8  ;;  %v1972_v61 = vadd.f32 %v1964_v30, %v1789_v9 }
 0x9c6   :  { %v1790_v43 = vsel %vm447_vm3, %v4020_v12, %v1772_v21 }
 0x9c7   :  { %v1973_v6 = vadd.f32 %v1965_v36, %v1790_v43  ;;  %2463 = vmatmul.mubr.bf16.gmra.mrb[40].mxu1 %v1977_v46  ;;  %v1774_v13 = vpop.permute.xlu0 %1773 }
 0x9c8   :  { %v1791_v23 = vsel %vm447_vm3, %v4021_v31, %v1774_v13 }
 0x9c9   :  { %v1776_v56 = vpop.permute.xlu1 %1775  ;;  %v1978_v22 = vpack.c.bf16 %v1973_v6, %v1972_v61  ;;  %v1974_v24 = vadd.f32 %v1966_v2, %v1791_v23 }
 0x9ca   :  { %v1792_v14 = vsel %vm447_vm3, %v4022_v28, %v1776_v56 }
 0x9cb   :  { %v1975_v42 = vadd.f32 %v1967_v20, %v1792_v14  ;;  %2466 = vmatprep.mubr.bf16.mxu1 %v1978_v22 }
 0x9cd   :  { %v1979_v59 = vpack.c.bf16 %v1975_v42, %v1974_v24 }
 0x9cf   :  { %2467 = vmatmul.mubr.bf16.gmra.mrb[44].mxu1 %v1979_v59 }
 0xa9a   :  { %v2464_v55 = vpop.f32.mrb[40].mxu1 }
 0xa9b   :  { %v2109_v58 = vadd.f32 %v2464_v55, %v3713_v3  ;;  %v2100_v11 = vpop.f32.mrb[41].mxu1 }
 0xa9c   :  { %v2101_v26 = vadd.f32 %v3713_v3, %v2100_v11  ;;  %v2465_v29 = vpop.f32.mrb[42].mxu1 }
 0xa9d   :  { %2141 = vst [vmem:[#allocation2 + $0x50] sm:$0xff] %v2109_v58  ;;  %v2112_v63 = vadd.f32 %v2465_v29, %v3713_v3  ;;  %v2103_v57 = vpop.f32.mrb[43].mxu1 }
 0xa9e   :  { %2139 = vst [vmem:[#allocation2 + $0x40] sm:$0xff] %v2101_v26  ;;  %v2104_v51 = vadd.f32 %v3713_v3, %v2103_v57 }
 0xa9f   :  { %2142 = vst [vmem:[#allocation2 + $0x58] sm:$0xff] %v2112_v63 }
 0xaa0   :  { %2140 = vst [vmem:[#allocation2 + $0x48] sm:$0xff] %v2104_v51 }
 0xaa2   :  { %v2468_v19 = vpop.f32.mrb[44].mxu1 }
 0xaa3   :  { %v2125_v52 = vadd.f32 %v2468_v19, %v3713_v3  ;;  %v2116_v7 = vpop.f32.mrb[45].mxu1 }
 0xaa4   :  { %v2117_v60 = vadd.f32 %v3713_v3, %v2116_v7  ;;  %v2469_v15 = vpop.f32.mrb[46].mxu1 }
 0xaa5   :  { %2145 = vst [vmem:[#allocation2 + $0x70] sm:$0xff] %v2125_v52  ;;  %v2128_v38 = vadd.f32 %v2469_v15, %v3713_v3  ;;  %v2119_v37 = vpop.f32.mrb[47].mxu1 }
 0xaa6   :  { %2143 = vst [vmem:[#allocation2 + $0x60] sm:$0xff] %v2117_v60  ;;  %v2120_v39 = vadd.f32 %v3713_v3, %v2119_v37 }
 0xaa7   :  { %2146 = vst [vmem:[#allocation2 + $0x78] sm:$0xff] %v2128_v38 }
 0xaa8   :  { %2144 = vst [vmem:[#allocation2 + $0x68] sm:$0xff] %v2120_v39 }
 0xaa9   :  { %2673 = shalt.err (!%p2670_p4)
}
 0xaaa   :  { %s2674_s29 = scalar_lea.hbm %s3977_s7, 2048 }
 0xaab   :  { %p2675_p5 = scmp.ne.s32.totalorder %s3977_s7, %s2674_s29  ;;  %p2678_p6 = scmp.lt.u32.totalorder %s2674_s29, %s3977_s7 }
 0xaad   :  { %p2680_p7 = pnand %p2678_p6, %p2675_p5 }
 0xaaf   :  { %2683 = shalt.err (!%p2680_p7)
}
 0xab0   :  { %s2691_s4 = smov 128   ;;  %s2692_s11 = smov 8  }
 0xab1   :  { %2158 = dma.vmem_to_hbm [thread:$0]  %s2153_s27, 2048, %s3977_s7, [#allocation3], %s2691_s4, %s2691_s4, %s2692_s11  }
 0xab2   :  { %2684 = dma.done.wait [#allocation3], 2048  }
 0xab3   :  { %2685 = vsyncadd [#allocation3], 4294965248 }
 0xab4   :  { %2162 = vsyncpa [#allocation3], 1 }

</bundles_post_ra>
